<compile_context>
chip_gen: v5e
topology: v5e:2x2
jax: 0.10.0
libtpu: 0.0.40
codegen_flags: <defaults>
</compile_context>

<pallas_src>
import functools
import math

import jax
import jax.numpy as jnp
from jax.experimental import pallas as pl
from jax.experimental.pallas import tpu as pltpu


# ----------------------------------------------------------------------------
# Kernel
# ----------------------------------------------------------------------------
def fcn_policy_kernel(x_ref, w1_ref, t1_ref, w2_ref, t2_ref, w3_ref, b3_ref,
                      out_ref):
    # ---- fc1 (+ folded bn1) + relu ----
    x = x_ref[...]                                                       # (TB, D)
    h1 = jnp.dot(x, w1_ref[...], preferred_element_type=jnp.float32)    # (TB, H)
    h1 = jnp.maximum(h1 + t1_ref[...], 0.0)

    # ---- fc2 (+ folded bn2) + relu ----
    h2 = jnp.dot(h1, w2_ref[...], preferred_element_type=jnp.float32)   # (TB, H)
    h2 = jnp.maximum(h2 + t2_ref[...], 0.0)

    # ---- fc_out + softmax over the (lane-padded) feature axis ----
    logits = jnp.dot(h2, w3_ref[...], preferred_element_type=jnp.float32)
    logits = logits + b3_ref[...]                                        # (TB, Opad)
    m = jnp.max(logits, axis=-1, keepdims=True)
    e = jnp.exp(logits - m)
    l = jnp.sum(e, axis=-1, keepdims=True)
    # Divide goes to the EUP (own bundle slot) instead of the VALU.
    out_ref[...] = e * pl.reciprocal(l, approx=True)


# ----------------------------------------------------------------------------
# Tiling helper: pick the batch tile from a VMEM budget (safe on v5e/v6e/v7x).
# ----------------------------------------------------------------------------
def _pick_batch_tile(batch, d, h, o_pad, *,
                     budget_bytes=24 * 1024 * 1024, max_tile=512):
    weight_bytes = 4 * (d * h + h * h + h * o_pad + 2 * h + o_pad)
    # Per batch row: x/out double-buffered by the pipeline (x2), plus the
    # single-buffered in-kernel intermediates h1, h2, logits/e.
    per_row_bytes = 4 * (2 * (d + o_pad) + 2 * h + 2 * o_pad)
    tb = (budget_bytes - weight_bytes) // per_row_bytes
    tb = max(8, min(int(tb), max_tile))
    tb = (tb // 8) * 8                                   # sublane multiple
    batch_up = ((batch + 7) // 8) * 8
    return min(tb, batch_up)


# ----------------------------------------------------------------------------
# Wrapper
# ----------------------------------------------------------------------------
@functools.partial(jax.jit, static_argnames=("output_dim",))
def fcn_policy_forward(x, params, output_dim):
    w1, t1, w2, t2, w3p, b3p = params
    b, d = x.shape
    h = w1.shape[1]
    o_pad = w3p.shape[1]

    tb = _pick_batch_tile(b, d, h, o_pad)
    n_steps = pl.cdiv(b, tb)
    b_pad = n_steps * tb
    if b_pad != b:                      # pad batch so every tile is full
        x = jnp.pad(x, ((0, b_pad - b), (0, 0)))

    const = lambda i: (0, 0)            # weights stay resident across the grid
    out = pl.pallas_call(
        fcn_policy_kernel,
        out_shape=jax.ShapeDtypeStruct((b_pad, o_pad), jnp.float32),
        grid=(n_steps,),
        in_specs=[
            pl.BlockSpec((tb, d), lambda i: (i, 0)),     # x  (pipelined)
            pl.BlockSpec((d, h), const),                 # w1 (folded bn1 scale)
            pl.BlockSpec((1, h), const),                 # t1
            pl.BlockSpec((h, h), const),                 # w2 (folded bn2 scale)
            pl.BlockSpec((1, h), const),                 # t2
            pl.BlockSpec((h, o_pad), const),             # w3 (lane-padded)
            pl.BlockSpec((1, o_pad), const),             # b3 (lane-padded)
        ],
        out_specs=pl.BlockSpec((tb, o_pad), lambda i: (i, 0)),
        compiler_params=pltpu.CompilerParams(
            dimension_semantics=("parallel",),
            vmem_limit_bytes=32 * 1024 * 1024,
        ),
    )(x, w1, t1, w2, t2, w3p, b3p)

    return out[:b, :output_dim]


# ----------------------------------------------------------------------------
# Parameters: synthetic Linear + BatchNorm (eval) params, BN folded + padded.
# ----------------------------------------------------------------------------
def make_params(key, input_dim, hidden_dim, output_dim, eps=1e-5, lane=128):
    ks = jax.random.split(key, 14)

    def linear(kw, kb, fan_in, fan_out):
        bound = 1.0 / math.sqrt(fan_in)
        w = jax.random.uniform(kw, (fan_in, fan_out), jnp.float32, -bound, bound)
        bias = jax.random.uniform(kb, (fan_out,), jnp.float32, -bound, bound)
        return w, bias

    w1, b1 = linear(ks[0], ks[1], input_dim, hidden_dim)
    w2, b2 = linear(ks[2], ks[3], hidden_dim, hidden_dim)
    w3, b3 = linear(ks[4], ks[5], hidden_dim, output_dim)

    def bn_params(kg, kb, km, kv, n):
        gamma = 1.0 + 0.1 * jax.random.normal(kg, (n,), jnp.float32)
        beta = 0.1 * jax.random.normal(kb, (n,), jnp.float32)
        mean = 0.1 * jax.random.normal(km, (n,), jnp.float32)
        var = 1.0 + 0.1 * jax.random.uniform(kv, (n,), jnp.float32)
        return gamma, beta, mean, var

    g1, be1, m1, v1 = bn_params(ks[6], ks[7], ks[8], ks[9], hidden_dim)
    g2, be2, m2, v2 = bn_params(ks[10], ks[11], ks[12], ks[13], hidden_dim)

    # Fold:  bn(x @ W + b) = x @ (W * scale) + ((b - mean) * scale + beta)
    scale1 = g1 / jnp.sqrt(v1 + eps)
    scale2 = g2 / jnp.sqrt(v2 + eps)
    w1f = w1 * scale1[None, :]
    w2f = w2 * scale2[None, :]
    t1 = be1 + (b1 - m1) * scale1
    t2 = be2 + (b2 - m2) * scale2

    # Lane-pad the output head: zero weight columns, -1e30 bias on pad columns
    # so exp(padded logit - max) underflows to exactly 0.
    o_pad = max(lane, ((output_dim + lane - 1) // lane) * lane)
    w3p = jnp.zeros((hidden_dim, o_pad), jnp.float32).at[:, :output_dim].set(w3)
    b3p = jnp.full((o_pad,), -1e30, jnp.float32).at[:output_dim].set(b3)

    return (w1f, t1.reshape(1, -1), w2f, t2.reshape(1, -1),
            w3p, b3p.reshape(1, -1))


def fcn_policy_ref(x, params, output_dim):
    """Pure-JAX reference for validation."""
    w1, t1, w2, t2, w3p, b3p = params
    h1 = jnp.maximum(x @ w1 + t1, 0.0)
    h2 = jnp.maximum(h1 @ w2 + t2, 0.0)
    logits = (h2 @ w3p + b3p)[:, :output_dim]
    return jax.nn.softmax(logits, axis=1)


if __name__ == "__main__":
    key = jax.random.PRNGKey(0)
    B, D, H, O = 1024, 16, 32, 3        # batch, input_dim, hidden_dim, output_dim

    kx, kp = jax.random.split(key)
    x = jax.random.normal(kx, (B, D), jnp.float32)
    params = make_params(kp, D, H, O)

    out = fcn_policy_forward(x, params, O)
    out = jax.block_until_ready(out)

    ref = fcn_policy_ref(x, params, O)
    assert out.shape == (B, O)
    # Tolerance relaxed slightly vs. exact division: softmax normalization uses
    # the EUP approximate reciprocal.
    assert jnp.allclose(out, ref, atol=1e-3, rtol=1e-3)
    assert jnp.allclose(jnp.sum(out, axis=1), 1.0, atol=1e-3)

    print("KERNEL_OK")
</pallas_src>

<mosaic_0001>
module attributes {stable_mosaic.version = 11 : i64} {
  func.func @fcn_policy_kernel(%arg0: i32, %arg1: memref<512x16xf32, #tpu.memory_space<vmem>>, %arg2: memref<16x32xf32, #tpu.memory_space<vmem>>, %arg3: memref<1x32xf32, #tpu.memory_space<vmem>>, %arg4: memref<32x32xf32, #tpu.memory_space<vmem>>, %arg5: memref<1x32xf32, #tpu.memory_space<vmem>>, %arg6: memref<32x128xf32, #tpu.memory_space<vmem>>, %arg7: memref<1x128xf32, #tpu.memory_space<vmem>>, %arg8: memref<512x128xf32, #tpu.memory_space<vmem>>) attributes {dimension_semantics = [#tpu.dimension_semantics<parallel>], iteration_bounds = array<i64: 2>, scalar_prefetch = 0 : i64, scratch_operands = 0 : i64, tpu.core_type = #tpu.core_type<tc>, window_params = [{transform_indices = @transform_0, window_bounds = array<i64: 512, 16>}, {pipeline_mode = #tpu.pipeline_mode<synchronous>, transform_indices = @transform_1, window_bounds = array<i64: 16, 32>}, {pipeline_mode = #tpu.pipeline_mode<synchronous>, transform_indices = @transform_2, window_bounds = array<i64: 1, 32>}, {pipeline_mode = #tpu.pipeline_mode<synchronous>, transform_indices = @transform_3, window_bounds = array<i64: 32, 32>}, {pipeline_mode = #tpu.pipeline_mode<synchronous>, transform_indices = @transform_4, window_bounds = array<i64: 1, 32>}, {pipeline_mode = #tpu.pipeline_mode<synchronous>, transform_indices = @transform_5, window_bounds = array<i64: 32, 128>}, {pipeline_mode = #tpu.pipeline_mode<synchronous>, transform_indices = @transform_6, window_bounds = array<i64: 1, 128>}, {transform_indices = @transform_7, window_bounds = array<i64: 512, 128>}]} {
    %c0 = arith.constant 0 : index
    %c0_0 = arith.constant 0 : index
    %0 = vector.load %arg1[%c0, %c0_0] : memref<512x16xf32, #tpu.memory_space<vmem>>, vector<512x16xf32>
    %c0_1 = arith.constant 0 : index
    %c0_2 = arith.constant 0 : index
    %1 = vector.load %arg2[%c0_1, %c0_2] : memref<16x32xf32, #tpu.memory_space<vmem>>, vector<16x32xf32>
    %cst = arith.constant dense<0.000000e+00> : vector<512x32xf32>
    %2 = tpu.matmul %0, %1, %cst {dimension_numbers = #tpu.dot_dimension_numbers<[1], [0], [0], [1], [0, 0, 1, 1], [], []>} : vector<512x16xf32>, vector<16x32xf32>, vector<512x32xf32> -> vector<512x32xf32>
    %c0_3 = arith.constant 0 : index
    %c0_4 = arith.constant 0 : index
    %3 = vector.load %arg3[%c0_3, %c0_4] : memref<1x32xf32, #tpu.memory_space<vmem>>, vector<1x32xf32>
    %4 = vector.broadcast %3 : vector<1x32xf32> to vector<512x32xf32>
    %5 = arith.addf %2, %4 : vector<512x32xf32>
    %cst_5 = arith.constant 0.000000e+00 : f32
    %6 = vector.broadcast %cst_5 : f32 to vector<512x32xf32>
    %7 = arith.maximumf %5, %6 : vector<512x32xf32>
    %c0_6 = arith.constant 0 : index
    %c0_7 = arith.constant 0 : index
    %8 = vector.load %arg4[%c0_6, %c0_7] : memref<32x32xf32, #tpu.memory_space<vmem>>, vector<32x32xf32>
    %cst_8 = arith.constant dense<0.000000e+00> : vector<512x32xf32>
    %9 = tpu.matmul %7, %8, %cst_8 {dimension_numbers = #tpu.dot_dimension_numbers<[1], [0], [0], [1], [0, 0, 1, 1], [], []>} : vector<512x32xf32>, vector<32x32xf32>, vector<512x32xf32> -> vector<512x32xf32>
    %c0_9 = arith.constant 0 : index
    %c0_10 = arith.constant 0 : index
    %10 = vector.load %arg5[%c0_9, %c0_10] : memref<1x32xf32, #tpu.memory_space<vmem>>, vector<1x32xf32>
    %11 = vector.broadcast %10 : vector<1x32xf32> to vector<512x32xf32>
    %12 = arith.addf %9, %11 : vector<512x32xf32>
    %cst_11 = arith.constant 0.000000e+00 : f32
    %13 = vector.broadcast %cst_11 : f32 to vector<512x32xf32>
    %14 = arith.maximumf %12, %13 : vector<512x32xf32>
    %c0_12 = arith.constant 0 : index
    %c0_13 = arith.constant 0 : index
    %15 = vector.load %arg6[%c0_12, %c0_13] : memref<32x128xf32, #tpu.memory_space<vmem>>, vector<32x128xf32>
    %cst_14 = arith.constant dense<0.000000e+00> : vector<512x128xf32>
    %16 = tpu.matmul %14, %15, %cst_14 {dimension_numbers = #tpu.dot_dimension_numbers<[1], [0], [0], [1], [0, 0, 1, 1], [], []>} : vector<512x32xf32>, vector<32x128xf32>, vector<512x128xf32> -> vector<512x128xf32>
    %c0_15 = arith.constant 0 : index
    %c0_16 = arith.constant 0 : index
    %17 = vector.load %arg7[%c0_15, %c0_16] : memref<1x128xf32, #tpu.memory_space<vmem>>, vector<1x128xf32>
    %18 = vector.broadcast %17 : vector<1x128xf32> to vector<512x128xf32>
    %19 = arith.addf %16, %18 : vector<512x128xf32>
    %cst_17 = arith.constant dense<0xFF800000> : vector<512xf32>
    %20 = vector.multi_reduction <maximumf>, %19, %cst_17 [1] : vector<512x128xf32> to vector<512xf32>
    %21 = vector.shape_cast %20 : vector<512xf32> to vector<512x1xf32>
    %22 = vector.broadcast %21 : vector<512x1xf32> to vector<512x128xf32>
    %23 = arith.subf %19, %22 : vector<512x128xf32>
    %24 = math.exp %23 : vector<512x128xf32>
    %cst_18 = arith.constant dense<0.000000e+00> : vector<512xf32>
    %25 = vector.multi_reduction <add>, %24, %cst_18 [1] : vector<512x128xf32> to vector<512xf32>
    %26 = vector.shape_cast %25 : vector<512xf32> to vector<512x1xf32>
    %27 = tpu.reciprocal %26 {approx = true} : vector<512x1xf32> -> vector<512x1xf32>
    %28 = vector.broadcast %27 : vector<512x1xf32> to vector<512x128xf32>
    %29 = arith.mulf %24, %28 : vector<512x128xf32>
    %c0_19 = arith.constant 0 : index
    %c0_20 = arith.constant 0 : index
    %30 = vector.load %arg8[%c0_19, %c0_20] : memref<512x128xf32, #tpu.memory_space<vmem>>, vector<512x128xf32>
    tpu.vector_store %arg8[%c0_19, %c0_20], %29 {strides = array<i32>} : memref<512x128xf32, #tpu.memory_space<vmem>>, vector<512x128xf32>,
    return
  }
  func.func @transform_0(%arg0: i32) -> (i32, i32) {
    %c0_i32 = arith.constant 0 : i32
    %c0_i32_0 = arith.constant 0 : i32
    return %arg0, %c0_i32 : i32, i32
  }
  func.func @transform_1(%arg0: i32) -> (i32, i32) {
    %c0_i32 = arith.constant 0 : i32
    %c0_i32_0 = arith.constant 0 : i32
    %c0_i32_1 = arith.constant 0 : i32
    return %c0_i32, %c0_i32_0 : i32, i32
  }
  func.func @transform_2(%arg0: i32) -> (i32, i32) {
    %c0_i32 = arith.constant 0 : i32
    %c0_i32_0 = arith.constant 0 : i32
    %c0_i32_1 = arith.constant 0 : i32
    return %c0_i32, %c0_i32_0 : i32, i32
  }
  func.func @transform_3(%arg0: i32) -> (i32, i32) {
    %c0_i32 = arith.constant 0 : i32
    %c0_i32_0 = arith.constant 0 : i32
    %c0_i32_1 = arith.constant 0 : i32
    return %c0_i32, %c0_i32_0 : i32, i32
  }
  func.func @transform_4(%arg0: i32) -> (i32, i32) {
    %c0_i32 = arith.constant 0 : i32
    %c0_i32_0 = arith.constant 0 : i32
    %c0_i32_1 = arith.constant 0 : i32
    return %c0_i32, %c0_i32_0 : i32, i32
  }
  func.func @transform_5(%arg0: i32) -> (i32, i32) {
    %c0_i32 = arith.constant 0 : i32
    %c0_i32_0 = arith.constant 0 : i32
    %c0_i32_1 = arith.constant 0 : i32
    return %c0_i32, %c0_i32_0 : i32, i32
  }
  func.func @transform_6(%arg0: i32) -> (i32, i32) {
    %c0_i32 = arith.constant 0 : i32
    %c0_i32_0 = arith.constant 0 : i32
    %c0_i32_1 = arith.constant 0 : i32
    return %c0_i32, %c0_i32_0 : i32, i32
  }
  func.func @transform_7(%arg0: i32) -> (i32, i32) {
    %c0_i32 = arith.constant 0 : i32
    %c0_i32_0 = arith.constant 0 : i32
    return %arg0, %c0_i32 : i32, i32
  }
}

</mosaic_0001>

<bundles_post_ra>
// kernel: fcn_policy_forward.1
= control target key start
LH: loop header
LB: loop body
LE: loop exit
PB: predicated region body
PF: predicated region fallthrough
CT: control target
= control target key end

     0   :  { %s2928_s24 = smov 0   ;;  %s4056_s0 = inlined_call_operand.vmem [shape: f32[1024,16], index: 0, kind: input, shape index: {}]   ;;  %s4057_s1 = inlined_call_operand.vmem [shape: f32[16,32], index: 1, kind: input, shape index: {}]   ;;  %s4058_s2 = inlined_call_operand.vmem [shape: f32[1,32], index: 2, kind: input, shape index: {}]   ;;  %s4059_s3 = inlined_call_operand.vmem [shape: f32[32,32], index: 3, kind: input, shape index: {}]   ;;  %s4060_s4 = inlined_call_operand.vmem [shape: f32[1,32], index: 4, kind: input, shape index: {}]   ;;  %s4061_s5 = inlined_call_operand.vmem [shape: f32[32,128], index: 5, kind: input, shape index: {}]   ;;  %s4062_s6 = inlined_call_operand.vmem [shape: f32[1,128], index: 6, kind: input, shape index: {}]   ;;  %s4063_s7 = inlined_call_operand.vmem [shape: f32[1024,128], index: 7, kind: output, shape index: {}]  }
   0x1 LB: > { %s2397_s25 = sadd.s32 4294967295, %s2886_s24   ;;  %p2401_p0 = scmp.ge.s32.totalorder %s2886_s24, 1  ;;  %s2886_s24 = sphi %s2928_s24, %s17_s24  }
   0x2   : > { %p238_p1 = scmp.lt.s32.totalorder %s2886_s24, 3 }
   0x4   : > { %p239_p2 = pnand %p2401_p0, %p238_p1 }
   0x5   : > { %s2402_s30 = sshll.u32 (!%p239_p2), %s2397_s25, 6 }
   0x6   : > { %242 = sbr.rel (%p239_p2) target bundleno = 1172 (0x494), region = 48  ;;  %p271_p3 = scmp.lt.s32.totalorder (!%p239_p2), %s2402_s30, 127 }
   0xb   : > { %v347_v0 = vld [vmem:[%s4057_s1 + $0x8] sm:$0xff]  ;;  %v346_v1 = vld [vmem:[%s4057_s1] sm:$0xff]  ;;  %s4065_s30 = smov (!%p271_p3, %s2402_s30), 127  ;;  %vm352_vm0 = vcmask 130048   ;;  %v821_v14 = vld [vmem:[%s4059_s3 + $0x18] sm:$0xff]  ;;  %vm826_vm1 = vcmask 261120  }
   0xc   : > { %559 = vmatpush.msra.mxu0 %v347_v0  ;;  %2600 = vmatpush.msra.mxu3 %v347_v0  ;;  %s2403_s8 = sshll.u32 %s4065_s30, 3  ;;  %v820_v15 = vld [vmem:[%s4059_s3 + $0x10] sm:$0xff]  ;;  %v819_v17 = vld [vmem:[%s4059_s3 + $0x8] sm:$0xff]  ;;  %v818_v18 = vld [vmem:[%s4059_s3] sm:$0xff] }
   0xd   : > { %s2950_s11 = scalar_lea.vmem %s4056_s0, %s2403_s8  ;;  %1031 = vmatpush.msra.mxu1 %v821_v14  ;;  %v2999_v22 = vld [vmem:[%s4058_s2] ss:$0 sm:$0xff]  ;;  %s3562_s20 = scalar_lea.vmem %s4063_s7, %s2403_s8 }
   0xe   : > { %560 = vmatpush.msra.mxu0 %v346_v1  ;;  %2601 = vmatpush.msra.mxu3 %v346_v1  ;;  %v282_v2 = vld [vmem:[%s2950_s11] sm:$0xff]  ;;  %v283_v3 = vld [vmem:[%s2950_s11 + $0x8] sm:$0xff]  ;;  %v284_v4 = vld [vmem:[%s2950_s11 + $0x10] sm:$0xff] }
   0xf   : > { %2406 = vmatmul.msk.f32.vlgmr.msra.gmra.mxu0 %vm352_vm0, %v282_v2  ;;  %v285_v5 = vld [vmem:[%s2950_s11 + $0x18] sm:$0xff]  ;;  %v286_v6 = vld [vmem:[%s2950_s11 + $0x20] sm:$0xff]  ;;  %v287_v7 = vld [vmem:[%s2950_s11 + $0x28] sm:$0xff]  ;;  %1032 = vmatpush.msra.mxu1 %v820_v15 }
  0x10   : > { %v288_v8 = vld [vmem:[%s2950_s11 + $0x30] sm:$0xff]  ;;  %v289_v9 = vld [vmem:[%s2950_s11 + $0x38] sm:$0xff]  ;;  %v290_v10 = vld [vmem:[%s2950_s11 + $0x40] sm:$0xff]  ;;  %2602 = vmatpush.msrb.mxu3 %v821_v14 }
  0x11   : > { %v291_v11 = vld [vmem:[%s2950_s11 + $0x48] sm:$0xff]  ;;  %v292_v12 = vld [vmem:[%s2950_s11 + $0x50] sm:$0xff]  ;;  %v293_v13 = vld [vmem:[%s2950_s11 + $0x58] sm:$0xff]  ;;  %1033 = vmatpush.msra.mxu1 %v819_v17 }
  0x12   : > { %v294_v16 = vld [vmem:[%s2950_s11 + $0x60] sm:$0xff]  ;;  %2603 = vmatpush.msrb.mxu3 %v820_v15  ;;  %v295_v19 = vld [vmem:[%s2950_s11 + $0x68] sm:$0xff]  ;;  %v296_v20 = vld [vmem:[%s2950_s11 + $0x70] sm:$0xff] }
  0x13   : > { %1034 = vmatpush.msra.mxu1 %v818_v18  ;;  %v297_v21 = vld [vmem:[%s2950_s11 + $0x78] sm:$0xff]  ;;  %v298_v24 = vld [vmem:[%s2950_s11 + $0x80] sm:$0xff]  ;;  %v299_v28 = vld [vmem:[%s2950_s11 + $0x88] sm:$0xff] }
  0x14   : > { %2604 = vmatpush.msrb.mxu3 %v819_v17  ;;  %v300_v32 = vld [vmem:[%s2950_s11 + $0x90] sm:$0xff]  ;;  %v301_v36 = vld [vmem:[%s2950_s11 + $0x98] sm:$0xff]  ;;  %v302_v40 = vld [vmem:[%s2950_s11 + $0xa0] sm:$0xff] }
  0x15   : > { %v303_v44 = vld [vmem:[%s2950_s11 + $0xa8] sm:$0xff]  ;;  %v304_v48 = vld [vmem:[%s2950_s11 + $0xb0] sm:$0xff]  ;;  %v305_v52 = vld [vmem:[%s2950_s11 + $0xb8] sm:$0xff] }
  0x16   : > { %2605 = vmatpush.msrb.mxu3 %v818_v18  ;;  %v306_v56 = vld [vmem:[%s2950_s11 + $0xc0] sm:$0xff]  ;;  %v307_v60 = vld [vmem:[%s2950_s11 + $0xc8] sm:$0xff]  ;;  %v308_v0 = vld [vmem:[%s2950_s11 + $0xd0] sm:$0xff] }
  0x17   : > { %2407 = vmatmul.msk.f32.gmra.mxu0 %vm352_vm0, %v283_v3  ;;  %v3074_v14 = vld [vmem:[%s4061_s5] sm:$0xff] }
  0x1f   : > { %2408 = vmatmul.msk.f32.gmra.mxu0 %vm352_vm0, %v284_v4  ;;  %v309_v4 = vld [vmem:[%s2950_s11 + $0xd8] sm:$0xff] }
  0x27   : > { %2409 = vmatmul.msk.f32.gmra.mxu0 %vm352_vm0, %v285_v5 }
  0x2f   : > { %2410 = vmatmul.msk.f32.gmra.mxu0 %vm352_vm0, %v286_v6 }
  0x37   : > { %2411 = vmatmul.msk.f32.gmra.mxu0 %vm352_vm0, %v287_v7  ;;  %v3052_v7 = vld [vmem:[%s4061_s5 + $0x18] sm:$0xff] }
  0x38   : > { %1504 = vmatpush.msra.mxu2 %v3052_v7 }
  0x3f   : > { %2412 = vmatmul.msk.f32.gmra.mxu0 %vm352_vm0, %v288_v8 }
  0x47   : > { %2413 = vmatmul.msk.f32.gmra.mxu0 %vm352_vm0, %v289_v9  ;;  %v310_v9 = vld [vmem:[%s2950_s11 + $0xe0] sm:$0xff] }
  0x4f   : > { %2414 = vmatmul.msk.f32.gmra.mxu0 %vm352_vm0, %v290_v10 }
  0x57   : > { %2415 = vmatmul.msk.f32.gmra.mxu0 %vm352_vm0, %v291_v11  ;;  %v3060_v11 = vld [vmem:[%s4061_s5 + $0x10] sm:$0xff] }
  0x58   : > { %1505 = vmatpush.msra.mxu2 %v3060_v11 }
  0x5f   : > { %2416 = vmatmul.msk.f32.gmra.mxu0 %vm352_vm0, %v292_v12 }
  0x67   : > { %2417 = vmatmul.msk.f32.gmra.mxu0 %vm352_vm0, %v293_v13  ;;  %v3067_v13 = vld [vmem:[%s4061_s5 + $0x8] sm:$0xff] }
  0x68   : > { %1506 = vmatpush.msra.mxu2 %v3067_v13 }
  0x6a   : > { %1507 = vmatpush.msra.mxu2 %v3074_v14 }
  0x6f   : > { %2418 = vmatmul.msk.f32.gmra.mxu0 %vm352_vm0, %v294_v16  ;;  %v311_v16 = vld [vmem:[%s2950_s11 + $0xe8] sm:$0xff] }
  0x77   : > { %2419 = vmatmul.msk.f32.gmra.mxu0 %vm352_vm0, %v295_v19 }
  0x7f   : > { %2420 = vmatmul.msk.f32.gmra.mxu0 %vm352_vm0, %v296_v20  ;;  %v312_v20 = vld [vmem:[%s2950_s11 + $0xf0] sm:$0xff] }
  0x87   : > { %2421 = vmatmul.msk.f32.gmra.mxu0 %vm352_vm0, %v297_v21 }
  0x8c   : > { %v562_v23 = vpop.f32.mrf.mxu0 }
  0x8d   : > { %v563_v25 = vadd.f32 %v2999_v22, %v562_v23 }
  0x8f   : > { %v754_v26 = vmax.f32 %v563_v25, 0.0  ;;  %2422 = vmatmul.msk.f32.gmra.mxu0 %vm352_vm0, %v298_v24  ;;  %v313_v25 = vld [vmem:[%s2950_s11 + $0xf8] sm:$0xff] }
  0x91   : > { %2470 = vmatmul.msk.f32.vlgmr.msra.gmra.mxu1 %vm826_vm1, %v754_v26 }
  0x94   : > { %v565_v27 = vpop.f32.mrf.mxu0 }
  0x95   : > { %v566_v29 = vadd.f32 %v2999_v22, %v565_v27 }
  0x97   : > { %v755_v30 = vmax.f32 %v566_v29, 0.0  ;;  %2423 = vmatmul.msk.f32.gmra.mxu0 %vm352_vm0, %v299_v28  ;;  %v3092_v28 = vld [vmem:[%s4060_s4] ss:$0 sm:$0xff] }
  0x99   : > { %2471 = vmatmul.msk.f32.gmra.mxu1 %vm826_vm1, %v755_v30  ;;  %v314_v30 = vld [vmem:[%s2950_s11 + $0x100] sm:$0xff] }
  0x9c   : > { %v568_v31 = vpop.f32.mrf.mxu0 }
  0x9d   : > { %v569_v33 = vadd.f32 %v2999_v22, %v568_v31 }
  0x9f   : > { %v756_v34 = vmax.f32 %v569_v33, 0.0  ;;  %2424 = vmatmul.msk.f32.gmra.mxu0 %vm352_vm0, %v300_v32 }
  0xa1   : > { %2472 = vmatmul.msk.f32.gmra.mxu1 %vm826_vm1, %v756_v34 }
  0xa4   : > { %v571_v35 = vpop.f32.mrf.mxu0 }
  0xa5   : > { %v572_v37 = vadd.f32 %v2999_v22, %v571_v35 }
  0xa7   : > { %v757_v38 = vmax.f32 %v572_v37, 0.0  ;;  %2425 = vmatmul.msk.f32.gmra.mxu0 %vm352_vm0, %v301_v36  ;;  %v315_v37 = vld [vmem:[%s2950_s11 + $0x108] sm:$0xff] }
  0xa9   : > { %2473 = vmatmul.msk.f32.gmra.mxu1 %vm826_vm1, %v757_v38 }
  0xac   : > { %v574_v39 = vpop.f32.mrf.mxu0 }
  0xad   : > { %v575_v41 = vadd.f32 %v2999_v22, %v574_v39 }
  0xaf   : > { %v758_v42 = vmax.f32 %v575_v41, 0.0  ;;  %2426 = vmatmul.msk.f32.gmra.mxu0 %vm352_vm0, %v302_v40 }
  0xb1   : > { %2474 = vmatmul.msk.f32.gmra.mxu1 %vm826_vm1, %v758_v42 }
  0xb4   : > { %v577_v43 = vpop.f32.mrf.mxu0 }
  0xb5   : > { %v578_v45 = vadd.f32 %v2999_v22, %v577_v43 }
  0xb7   : > { %v759_v46 = vmax.f32 %v578_v45, 0.0  ;;  %2427 = vmatmul.msk.f32.gmra.mxu0 %vm352_vm0, %v303_v44  ;;  %v316_v44 = vld [vmem:[%s2950_s11 + $0x110] sm:$0xff] }
  0xb9   : > { %2475 = vmatmul.msk.f32.gmra.mxu1 %vm826_vm1, %v759_v46 }
  0xbc   : > { %v580_v47 = vpop.f32.mrf.mxu0 }
  0xbd   : > { %v581_v49 = vadd.f32 %v2999_v22, %v580_v47 }
  0xbf   : > { %v760_v50 = vmax.f32 %v581_v49, 0.0  ;;  %2428 = vmatmul.msk.f32.gmra.mxu0 %vm352_vm0, %v304_v48 }
  0xc1   : > { %2476 = vmatmul.msk.f32.gmra.mxu1 %vm826_vm1, %v760_v50 }
  0xc4   : > { %v583_v51 = vpop.f32.mrf.mxu0 }
  0xc5   : > { %v584_v53 = vadd.f32 %v2999_v22, %v583_v51  ;;  %v317_v51 = vld [vmem:[%s2950_s11 + $0x118] sm:$0xff] }
  0xc7   : > { %v761_v54 = vmax.f32 %v584_v53, 0.0  ;;  %2429 = vmatmul.msk.f32.gmra.mxu0 %vm352_vm0, %v305_v52 }
  0xc9   : > { %2477 = vmatmul.msk.f32.gmra.mxu1 %vm826_vm1, %v761_v54 }
  0xcc   : > { %v586_v55 = vpop.f32.mrf.mxu0 }
  0xcd   : > { %v587_v57 = vadd.f32 %v2999_v22, %v586_v55 }
  0xcf   : > { %v762_v58 = vmax.f32 %v587_v57, 0.0  ;;  %2430 = vmatmul.msk.f32.gmra.mxu0 %vm352_vm0, %v306_v56 }
  0xd1   : > { %2478 = vmatmul.msk.f32.gmra.mxu1 %vm826_vm1, %v762_v58  ;;  %v318_v58 = vld [vmem:[%s2950_s11 + $0x120] sm:$0xff] }
  0xd4   : > { %v589_v59 = vpop.f32.mrf.mxu0 }
  0xd5   : > { %v590_v61 = vadd.f32 %v2999_v22, %v589_v59 }
  0xd7   : > { %v763_v62 = vmax.f32 %v590_v61, 0.0  ;;  %2431 = vmatmul.msk.f32.gmra.mxu0 %vm352_vm0, %v307_v60 }
  0xd9   : > { %2479 = vmatmul.msk.f32.gmra.mxu1 %vm826_vm1, %v763_v62 }
  0xdc   : > { %v592_v63 = vpop.f32.mrf.mxu0 }
  0xdd   : > { %v593_v1 = vadd.f32 %v2999_v22, %v592_v63 }
  0xdf   : > { %v764_v2 = vmax.f32 %v593_v1, 0.0  ;;  %2432 = vmatmul.msk.f32.gmra.mxu0 %vm352_vm0, %v308_v0  ;;  %v319_v1 = vld [vmem:[%s2950_s11 + $0x128] sm:$0xff] }
  0xe1   : > { %2480 = vmatmul.msk.f32.gmra.mxu1 %vm826_vm1, %v764_v2 }
  0xe4   : > { %v595_v3 = vpop.f32.mrf.mxu0 }
  0xe5   : > { %v596_v5 = vadd.f32 %v2999_v22, %v595_v3 }
  0xe7   : > { %v765_v6 = vmax.f32 %v596_v5, 0.0  ;;  %2433 = vmatmul.msk.f32.gmra.mxu0 %vm352_vm0, %v309_v4 }
  0xe9   : > { %2481 = vmatmul.msk.f32.gmra.mxu1 %vm826_vm1, %v765_v6 }
  0xec   : > { %v598_v8 = vpop.f32.mrf.mxu0 }
  0xed   : > { %v599_v10 = vadd.f32 %v2999_v22, %v598_v8 }
  0xef   : > { %v766_v12 = vmax.f32 %v599_v10, 0.0  ;;  %2434 = vmatmul.msk.f32.gmra.mxu0 %vm352_vm0, %v310_v9  ;;  %v320_v9 = vld [vmem:[%s2950_s11 + $0x130] sm:$0xff] }
  0xf1   : > { %2482 = vmatmul.msk.f32.gmra.mxu1 %vm826_vm1, %v766_v12 }
  0xf4   : > { %v601_v15 = vpop.f32.mrf.mxu0 }
  0xf5   : > { %v602_v17 = vadd.f32 %v2999_v22, %v601_v15 }
  0xf7   : > { %v767_v18 = vmax.f32 %v602_v17, 0.0  ;;  %2435 = vmatmul.msk.f32.gmra.mxu0 %vm352_vm0, %v311_v16 }
  0xf9   : > { %2483 = vmatmul.msk.f32.gmra.mxu1 %vm826_vm1, %v767_v18 }
  0xfc   : > { %v604_v19 = vpop.f32.mrf.mxu0 }
  0xfd   : > { %v605_v21 = vadd.f32 %v2999_v22, %v604_v19  ;;  %v321_v19 = vld [vmem:[%s2950_s11 + $0x138] sm:$0xff] }
  0xff   : > { %v768_v23 = vmax.f32 %v605_v21, 0.0  ;;  %2436 = vmatmul.msk.f32.gmra.mxu0 %vm352_vm0, %v312_v20 }
 0x101   : > { %2484 = vmatmul.msk.f32.gmra.mxu1 %vm826_vm1, %v768_v23 }
 0x104   : > { %v607_v24 = vpop.f32.mrf.mxu0 }
 0x105   : > { %v608_v26 = vadd.f32 %v2999_v22, %v607_v24 }
 0x107   : > { %v769_v27 = vmax.f32 %v608_v26, 0.0  ;;  %2437 = vmatmul.msk.f32.gmra.mxu0 %vm352_vm0, %v313_v25 }
 0x109   : > { %2485 = vmatmul.msk.f32.gmra.mxu1 %vm826_vm1, %v769_v27  ;;  %v322_v27 = vld [vmem:[%s2950_s11 + $0x140] sm:$0xff] }
 0x10c   : > { %v610_v29 = vpop.f32.mrf.mxu0 }
 0x10d   : > { %v611_v31 = vadd.f32 %v2999_v22, %v610_v29 }
 0x10e   : > { %v1036_v32 = vpop.f32.mrf.mxu1 }
 0x10f   : > { %v770_v33 = vmax.f32 %v611_v31, 0.0  ;;  %v1037_v34 = vadd.f32 %v3092_v28, %v1036_v32  ;;  %2438 = vmatmul.msk.f32.gmra.mxu0 %vm352_vm0, %v314_v30 }
 0x111   : > { %v1228_v35 = vmax.f32 %v1037_v34, 0.0  ;;  %2486 = vmatmul.msk.f32.gmra.mxu1 %vm826_vm1, %v770_v33 }
 0x113   : > { %2534 = vmatmul.msk.f32.vlgmr.msra.gmra.mxu2 %vm826_vm1, %v1228_v35  ;;  %v323_v35 = vld [vmem:[%s2950_s11 + $0x148] sm:$0xff] }
 0x114   : > { %v613_v36 = vpop.f32.mrf.mxu0 }
 0x115   : > { %v614_v38 = vadd.f32 %v2999_v22, %v613_v36 }
 0x116   : > { %v1039_v39 = vpop.f32.mrf.mxu1 }
 0x117   : > { %v771_v40 = vmax.f32 %v614_v38, 0.0  ;;  %v1040_v41 = vadd.f32 %v3092_v28, %v1039_v39  ;;  %2439 = vmatmul.msk.f32.gmra.mxu0 %vm352_vm0, %v315_v37 }
 0x119   : > { %v1229_v42 = vmax.f32 %v1040_v41, 0.0  ;;  %2487 = vmatmul.msk.f32.gmra.mxu1 %vm826_vm1, %v771_v40 }
 0x11b   : > { %2535 = vmatmul.msk.f32.gmra.mxu2 %vm826_vm1, %v1229_v42  ;;  %v324_v42 = vld [vmem:[%s2950_s11 + $0x150] sm:$0xff] }
 0x11c   : > { %v616_v43 = vpop.f32.mrf.mxu0 }
 0x11d   : > { %v617_v45 = vadd.f32 %v2999_v22, %v616_v43 }
 0x11e   : > { %v1042_v46 = vpop.f32.mrf.mxu1 }
 0x11f   : > { %v772_v47 = vmax.f32 %v617_v45, 0.0  ;;  %v1043_v48 = vadd.f32 %v3092_v28, %v1042_v46  ;;  %2440 = vmatmul.msk.f32.gmra.mxu0 %vm352_vm0, %v316_v44 }
 0x121   : > { %v1230_v49 = vmax.f32 %v1043_v48, 0.0  ;;  %2488 = vmatmul.msk.f32.gmra.mxu1 %vm826_vm1, %v772_v47 }
 0x123   : > { %2536 = vmatmul.msk.f32.gmra.mxu2 %vm826_vm1, %v1230_v49  ;;  %v325_v49 = vld [vmem:[%s2950_s11 + $0x158] sm:$0xff] }
 0x124   : > { %v619_v50 = vpop.f32.mrf.mxu0 }
 0x125   : > { %v620_v52 = vadd.f32 %v2999_v22, %v619_v50 }
 0x126   : > { %v1045_v53 = vpop.f32.mrf.mxu1 }
 0x127   : > { %v773_v54 = vmax.f32 %v620_v52, 0.0  ;;  %v1046_v55 = vadd.f32 %v3092_v28, %v1045_v53  ;;  %2441 = vmatmul.msk.f32.gmra.mxu0 %vm352_vm0, %v317_v51 }
 0x129   : > { %v1231_v56 = vmax.f32 %v1046_v55, 0.0  ;;  %2489 = vmatmul.msk.f32.gmra.mxu1 %vm826_vm1, %v773_v54 }
 0x12b   : > { %2537 = vmatmul.msk.f32.gmra.mxu2 %vm826_vm1, %v1231_v56  ;;  %v326_v56 = vld [vmem:[%s2950_s11 + $0x160] sm:$0xff] }
 0x12c   : > { %v622_v57 = vpop.f32.mrf.mxu0 }
 0x12d   : > { %v623_v59 = vadd.f32 %v2999_v22, %v622_v57 }
 0x12e   : > { %v1048_v60 = vpop.f32.mrf.mxu1 }
 0x12f   : > { %v774_v61 = vmax.f32 %v623_v59, 0.0  ;;  %v1049_v62 = vadd.f32 %v3092_v28, %v1048_v60  ;;  %2442 = vmatmul.msk.f32.gmra.mxu0 %vm352_vm0, %v318_v58 }
 0x131   : > { %v1232_v63 = vmax.f32 %v1049_v62, 0.0  ;;  %2490 = vmatmul.msk.f32.gmra.mxu1 %vm826_vm1, %v774_v61  ;;  %v331_v61 = vld [vmem:[%s2950_s11 + $0x188] sm:$0xff] }
 0x132   : > { %2455 = vmatmul.msk.f32.vlgmr.msra.gmra.mxu3 %vm352_vm0, %v331_v61 }
 0x133   : > { %2538 = vmatmul.msk.f32.gmra.mxu2 %vm826_vm1, %v1232_v63  ;;  %2606 = vmatpush.msra.mxu3 %v3052_v7 }
 0x134   : > { %v625_v0 = vpop.f32.mrf.mxu0 }
 0x135   : > { %v626_v2 = vadd.f32 %v2999_v22, %v625_v0  ;;  %v327_v0 = vld [vmem:[%s2950_s11 + $0x168] sm:$0xff]  ;;  %2607 = vmatpush.msra.mxu3 %v3060_v11 }
 0x136   : > { %v1051_v3 = vpop.f32.mrf.mxu1 }
 0x137   : > { %v775_v4 = vmax.f32 %v626_v2, 0.0  ;;  %v1052_v5 = vadd.f32 %v3092_v28, %v1051_v3  ;;  %2443 = vmatmul.msk.f32.gmra.mxu0 %vm352_vm0, %v319_v1  ;;  %2608 = vmatpush.msra.mxu3 %v3067_v13 }
 0x139   : > { %v1233_v6 = vmax.f32 %v1052_v5, 0.0  ;;  %2491 = vmatmul.msk.f32.gmra.mxu1 %vm826_vm1, %v775_v4  ;;  %v332_v5 = vld [vmem:[%s2950_s11 + $0x190] sm:$0xff]  ;;  %2609 = vmatpush.msra.mxu3 %v3074_v14  ;;  %v333_v14 = vld [vmem:[%s2950_s11 + $0x198] sm:$0xff] }
 0x13a   : > { %2456 = vmatmul.msk.f32.gmra.mxu3 %vm352_vm0, %v332_v5 }
 0x13b   : > { %2539 = vmatmul.msk.f32.gmra.mxu2 %vm826_vm1, %v1233_v6  ;;  %v328_v6 = vld [vmem:[%s2950_s11 + $0x170] sm:$0xff] }
 0x13c   : > { %v628_v8 = vpop.f32.mrf.mxu0 }
 0x13d   : > { %v629_v10 = vadd.f32 %v2999_v22, %v628_v8 }
 0x13e   : > { %v1054_v12 = vpop.f32.mrf.mxu1 }
 0x13f   : > { %v776_v15 = vmax.f32 %v629_v10, 0.0  ;;  %v1055_v16 = vadd.f32 %v3092_v28, %v1054_v12  ;;  %2444 = vmatmul.msk.f32.gmra.mxu0 %vm352_vm0, %v320_v9 }
 0x141   : > { %v1234_v17 = vmax.f32 %v1055_v16, 0.0  ;;  %2492 = vmatmul.msk.f32.gmra.mxu1 %vm826_vm1, %v776_v15  ;;  %v329_v16 = vld [vmem:[%s2950_s11 + $0x178] sm:$0xff] }
 0x142   : > { %2457 = vmatmul.msk.f32.gmra.mxu3 %vm352_vm0, %v333_v14  ;;  %v340_v14 = vld [vmem:[%s2950_s11 + $0x1d0] sm:$0xff] }
 0x143   : > { %2540 = vmatmul.msk.f32.gmra.mxu2 %vm826_vm1, %v1234_v17 }
 0x144   : > { %v631_v18 = vpop.f32.mrf.mxu0 }
 0x145   : > { %v632_v20 = vadd.f32 %v2999_v22, %v631_v18 }
 0x146   : > { %v1057_v21 = vpop.f32.mrf.mxu1 }
 0x147   : > { %v777_v23 = vmax.f32 %v632_v20, 0.0  ;;  %v1058_v24 = vadd.f32 %v3092_v28, %v1057_v21  ;;  %2445 = vmatmul.msk.f32.gmra.mxu0 %vm352_vm0, %v321_v19  ;;  %v334_v21 = vld [vmem:[%s2950_s11 + $0x1a0] sm:$0xff] }
 0x149   : > { %v1235_v25 = vmax.f32 %v1058_v24, 0.0  ;;  %2493 = vmatmul.msk.f32.gmra.mxu1 %vm826_vm1, %v777_v23 }
 0x14a   : > { %2458 = vmatmul.msk.f32.gmra.mxu3 %vm352_vm0, %v334_v21 }
 0x14b   : > { %2541 = vmatmul.msk.f32.gmra.mxu2 %vm826_vm1, %v1235_v25  ;;  %v330_v25 = vld [vmem:[%s2950_s11 + $0x180] sm:$0xff] }
 0x14c   : > { %v634_v26 = vpop.f32.mrf.mxu0 }
 0x14d   : > { %v635_v29 = vadd.f32 %v2999_v22, %v634_v26 }
 0x14e   : > { %v1060_v30 = vpop.f32.mrf.mxu1 }
 0x14f   : > { %v778_v31 = vmax.f32 %v635_v29, 0.0  ;;  %v1061_v32 = vadd.f32 %v3092_v28, %v1060_v30  ;;  %2446 = vmatmul.msk.f32.gmra.mxu0 %vm352_vm0, %v322_v27 }
 0x151   : > { %v1236_v33 = vmax.f32 %v1061_v32, 0.0  ;;  %2494 = vmatmul.msk.f32.gmra.mxu1 %vm826_vm1, %v778_v31  ;;  %v335_v31 = vld [vmem:[%s2950_s11 + $0x1a8] sm:$0xff] }
 0x152   : > { %2459 = vmatmul.msk.f32.gmra.mxu3 %vm352_vm0, %v335_v31 }
 0x153   : > { %2542 = vmatmul.msk.f32.gmra.mxu2 %vm826_vm1, %v1236_v33  ;;  %v3213_v33 = vld [vmem:[%s4062_s6] ss:$0 sm:$0xff] }
 0x154   : > { %v637_v34 = vpop.f32.mrf.mxu0 }
 0x155   : > { %v638_v36 = vadd.f32 %v2999_v22, %v637_v34 }
 0x156   : > { %v1063_v37 = vpop.f32.mrf.mxu1 }
 0x157   : > { %v779_v38 = vmax.f32 %v638_v36, 0.0  ;;  %v1064_v39 = vadd.f32 %v3092_v28, %v1063_v37  ;;  %2447 = vmatmul.msk.f32.gmra.mxu0 %vm352_vm0, %v323_v35 }
 0x159   : > { %v1237_v40 = vmax.f32 %v1064_v39, 0.0  ;;  %2495 = vmatmul.msk.f32.gmra.mxu1 %vm826_vm1, %v779_v38 }
 0x15b   : > { %2543 = vmatmul.msk.f32.gmra.mxu2 %vm826_vm1, %v1237_v40 }
 0x15c   : > { %v640_v41 = vpop.f32.mrf.mxu0 }
 0x15d   : > { %v641_v43 = vadd.f32 %v2999_v22, %v640_v41  ;;  %v336_v41 = vld [vmem:[%s2950_s11 + $0x1b0] sm:$0xff] }
 0x15e   : > { %v1066_v44 = vpop.f32.mrf.mxu1  ;;  %2460 = vmatmul.msk.f32.gmra.mxu3 %vm352_vm0, %v336_v41 }
 0x15f   : > { %v780_v45 = vmax.f32 %v641_v43, 0.0  ;;  %v1067_v46 = vadd.f32 %v3092_v28, %v1066_v44  ;;  %2448 = vmatmul.msk.f32.gmra.mxu0 %vm352_vm0, %v324_v42 }
 0x161   : > { %v1238_v47 = vmax.f32 %v1067_v46, 0.0  ;;  %2496 = vmatmul.msk.f32.gmra.mxu1 %vm826_vm1, %v780_v45 }
 0x163   : > { %2544 = vmatmul.msk.f32.gmra.mxu2 %vm826_vm1, %v1238_v47 }
 0x164   : > { %v643_v48 = vpop.f32.mrf.mxu0 }
 0x165   : > { %v644_v50 = vadd.f32 %v2999_v22, %v643_v48 }
 0x166   : > { %v1069_v51 = vpop.f32.mrf.mxu1 }
 0x167   : > { %v781_v52 = vmax.f32 %v644_v50, 0.0  ;;  %v1070_v53 = vadd.f32 %v3092_v28, %v1069_v51  ;;  %2449 = vmatmul.msk.f32.gmra.mxu0 %vm352_vm0, %v325_v49  ;;  %v337_v50 = vld [vmem:[%s2950_s11 + $0x1b8] sm:$0xff] }
 0x168   : > { %2461 = vmatmul.msk.f32.gmra.mxu3 %vm352_vm0, %v337_v50 }
 0x169   : > { %v1239_v54 = vmax.f32 %v1070_v53, 0.0  ;;  %2497 = vmatmul.msk.f32.gmra.mxu1 %vm826_vm1, %v781_v52 }
 0x16b   : > { %2545 = vmatmul.msk.f32.gmra.mxu2 %vm826_vm1, %v1239_v54 }
 0x16c   : > { %v646_v55 = vpop.f32.mrf.mxu0 }
 0x16d   : > { %v647_v57 = vadd.f32 %v2999_v22, %v646_v55 }
 0x16e   : > { %v1072_v58 = vpop.f32.mrf.mxu1 }
 0x16f   : > { %v782_v59 = vmax.f32 %v647_v57, 0.0  ;;  %v1073_v60 = vadd.f32 %v3092_v28, %v1072_v58  ;;  %2450 = vmatmul.msk.f32.gmra.mxu0 %vm352_vm0, %v326_v56 }
 0x171   : > { %v1240_v62 = vmax.f32 %v1073_v60, 0.0  ;;  %2498 = vmatmul.msk.f32.gmra.mxu1 %vm826_vm1, %v782_v59  ;;  %v338_v59 = vld [vmem:[%s2950_s11 + $0x1c0] sm:$0xff] }
 0x172   : > { %2462 = vmatmul.msk.f32.gmra.mxu3 %vm352_vm0, %v338_v59 }
 0x173   : > { %2546 = vmatmul.msk.f32.gmra.mxu2 %vm826_vm1, %v1240_v62 }
 0x174   : > { %v649_v63 = vpop.f32.mrf.mxu0 }
 0x175   : > { %v650_v1 = vadd.f32 %v2999_v22, %v649_v63 }
 0x176   : > { %v1075_v2 = vpop.f32.mrf.mxu1 }
 0x177   : > { %v783_v3 = vmax.f32 %v650_v1, 0.0  ;;  %v1076_v4 = vadd.f32 %v3092_v28, %v1075_v2  ;;  %2451 = vmatmul.msk.f32.gmra.mxu0 %vm352_vm0, %v327_v0 }
 0x179   : > { %v1241_v7 = vmax.f32 %v1076_v4, 0.0  ;;  %2499 = vmatmul.msk.f32.gmra.mxu1 %vm826_vm1, %v783_v3  ;;  %v339_v4 = vld [vmem:[%s2950_s11 + $0x1c8] sm:$0xff] }
 0x17a   : > { %2463 = vmatmul.msk.f32.gmra.mxu3 %vm352_vm0, %v339_v4 }
 0x17b   : > { %2547 = vmatmul.msk.f32.gmra.mxu2 %vm826_vm1, %v1241_v7 }
 0x17c   : > { %v652_v11 = vpop.f32.mrf.mxu0 }
 0x17d   : > { %v653_v13 = vadd.f32 %v2999_v22, %v652_v11 }
 0x17e   : > { %v1078_v8 = vpop.f32.mrf.mxu1 }
 0x17f   : > { %v784_v9 = vmax.f32 %v653_v13, 0.0  ;;  %v1079_v10 = vadd.f32 %v3092_v28, %v1078_v8  ;;  %2452 = vmatmul.msk.f32.gmra.mxu0 %vm352_vm0, %v328_v6 }
 0x181   : > { %v1242_v12 = vmax.f32 %v1079_v10, 0.0  ;;  %2500 = vmatmul.msk.f32.gmra.mxu1 %vm826_vm1, %v784_v9 }
 0x182   : > { %2464 = vmatmul.msk.f32.gmra.mxu3 %vm352_vm0, %v340_v14 }
 0x183   : > { %2548 = vmatmul.msk.f32.gmra.mxu2 %vm826_vm1, %v1242_v12 }
 0x184   : > { %v655_v15 = vpop.f32.mrf.mxu0 }
 0x185   : > { %v656_v17 = vadd.f32 %v2999_v22, %v655_v15 }
 0x186   : > { %v1081_v18 = vpop.f32.mrf.mxu1 }
 0x187   : > { %v785_v19 = vmax.f32 %v656_v17, 0.0  ;;  %v1082_v20 = vadd.f32 %v3092_v28, %v1081_v18  ;;  %2453 = vmatmul.msk.f32.gmra.mxu0 %vm352_vm0, %v329_v16 }
 0x189   : > { %v1243_v23 = vmax.f32 %v1082_v20, 0.0  ;;  %2501 = vmatmul.msk.f32.gmra.mxu1 %vm826_vm1, %v785_v19 }
 0x18b   : > { %2549 = vmatmul.msk.f32.gmra.mxu2 %vm826_vm1, %v1243_v23  ;;  %v341_v23 = vld [vmem:[%s2950_s11 + $0x1d8] sm:$0xff] }
 0x18c   : > { %v658_v24 = vpop.f32.mrf.mxu0  ;;  %2465 = vmatmul.msk.f32.gmra.mxu3 %vm352_vm0, %v341_v23 }
 0x18d   : > { %v659_v26 = vadd.f32 %v2999_v22, %v658_v24 }
 0x18e   : > { %v1084_v27 = vpop.f32.mrf.mxu1 }
 0x18f   : > { %v786_v29 = vmax.f32 %v659_v26, 0.0  ;;  %v1085_v30 = vadd.f32 %v3092_v28, %v1084_v27  ;;  %2454 = vmatmul.msk.f32.gmra.mxu0 %vm352_vm0, %v330_v25 }
 0x191   : > { %v1244_v32 = vmax.f32 %v1085_v30, 0.0  ;;  %2502 = vmatmul.msk.f32.gmra.mxu1 %vm826_vm1, %v786_v29 }
 0x193   : > { %2550 = vmatmul.msk.f32.gmra.mxu2 %vm826_vm1, %v1244_v32 }
 0x194   : > { %v661_v34 = vpop.f32.mrf.mxu0 }
 0x195   : > { %v662_v35 = vadd.f32 %v2999_v22, %v661_v34  ;;  %v342_v34 = vld [vmem:[%s2950_s11 + $0x1e0] sm:$0xff] }
 0x196   : > { %v1087_v36 = vpop.f32.mrf.mxu1  ;;  %v1509_v37 = vpop.f32.mrf.mxu2  ;;  %2466 = vmatmul.msk.f32.gmra.mxu3 %vm352_vm0, %v342_v34 }
 0x197   : > { %v787_v38 = vmax.f32 %v662_v35, 0.0  ;;  %v1088_v39 = vadd.f32 %v3092_v28, %v1087_v36  ;;  %v3218_v40 = vadd.f32 %v3213_v33, %v1509_v37 }
 0x199   : > { %v1245_v42 = vmax.f32 %v1088_v39, 0.0  ;;  %2503 = vmatmul.msk.f32.gmra.mxu1 %vm826_vm1, %v787_v38  ;;  %1701 = vmax.xlane.f32.xlu0 %v3218_v40 }
 0x19b   : > { %2551 = vmatmul.msk.f32.gmra.mxu2 %vm826_vm1, %v1245_v42 }
 0x19c   : > { %v664_v43 = vpop.f32.mrf.mxu0 }
 0x19d   : > { %v665_v44 = vadd.f32 %v2999_v22, %v664_v43 }
 0x19e   : > { %v1090_v45 = vpop.f32.mrf.mxu1  ;;  %v1512_v46 = vpop.f32.mrf.mxu2 }
 0x19f   : > { %v788_v47 = vmax.f32 %v665_v44, 0.0  ;;  %v1091_v48 = vadd.f32 %v3092_v28, %v1090_v45  ;;  %v3228_v49 = vadd.f32 %v3213_v33, %v1512_v46  ;;  %v343_v44 = vld [vmem:[%s2950_s11 + $0x1e8] sm:$0xff] }
 0x1a0   : > { %2467 = vmatmul.msk.f32.gmra.mxu3 %vm352_vm0, %v343_v44 }
 0x1a1   : > { %v1246_v51 = vmax.f32 %v1091_v48, 0.0  ;;  %2504 = vmatmul.msk.f32.gmra.mxu1 %vm826_vm1, %v788_v47  ;;  %1703 = vmax.xlane.f32.xlu0 %v3228_v49 }
 0x1a3   : > { %2552 = vmatmul.msk.f32.gmra.mxu2 %vm826_vm1, %v1246_v51 }
 0x1a4   : > { %v667_v52 = vpop.f32.mrf.mxu0 }
 0x1a5   : > { %v668_v53 = vadd.f32 %v2999_v22, %v667_v52 }
 0x1a6   : > { %v1093_v54 = vpop.f32.mrf.mxu1  ;;  %v1515_v55 = vpop.f32.mrf.mxu2 }
 0x1a7   : > { %v789_v56 = vmax.f32 %v668_v53, 0.0  ;;  %v1094_v57 = vadd.f32 %v3092_v28, %v1093_v54  ;;  %v3238_v58 = vadd.f32 %v3213_v33, %v1515_v55  ;;  %v344_v54 = vld [vmem:[%s2950_s11 + $0x1f0] sm:$0xff] }
 0x1a8   : > { %2468 = vmatmul.msk.f32.gmra.mxu3 %vm352_vm0, %v344_v54 }
 0x1a9   : > { %v1247_v60 = vmax.f32 %v1094_v57, 0.0  ;;  %2505 = vmatmul.msk.f32.gmra.mxu1 %vm826_vm1, %v789_v56  ;;  %1705 = vmax.xlane.f32.xlu1 %v3238_v58 }
 0x1ab   : > { %2553 = vmatmul.msk.f32.gmra.mxu2 %vm826_vm1, %v1247_v60 }
 0x1ac   : > { %v670_v61 = vpop.f32.mrf.mxu0 }
 0x1ad   : > { %v671_v62 = vadd.f32 %v2999_v22, %v670_v61 }
 0x1ae   : > { %v1096_v63 = vpop.f32.mrf.mxu1  ;;  %v1518_v0 = vpop.f32.mrf.mxu2 }
 0x1af   : > { %v790_v1 = vmax.f32 %v671_v62, 0.0  ;;  %v1097_v2 = vadd.f32 %v3092_v28, %v1096_v63  ;;  %v3248_v3 = vadd.f32 %v3213_v33, %v1518_v0  ;;  %v345_v0 = vld [vmem:[%s2950_s11 + $0x1f8] sm:$0xff] }
 0x1b0   : > { %2469 = vmatmul.msk.f32.gmra.mxu3 %vm352_vm0, %v345_v0 }
 0x1b1   : > { %v1248_v5 = vmax.f32 %v1097_v2, 0.0  ;;  %2506 = vmatmul.msk.f32.gmra.mxu1 %vm826_vm1, %v790_v1  ;;  %1707 = vmax.xlane.f32.xlu1 %v3248_v3 }
 0x1b3   : > { %2554 = vmatmul.msk.f32.gmra.mxu2 %vm826_vm1, %v1248_v5 }
 0x1b4   : > { %v673_v7 = vpop.f32.mrf.mxu0 }
 0x1b5   : > { %v674_v11 = vadd.f32 %v2999_v22, %v673_v7  ;;  %v709_v23 = vpop.f32.mrf.mxu3 }
 0x1b6   : > { %v1099_v6 = vpop.f32.mrf.mxu1  ;;  %v1521_v13 = vpop.f32.mrf.mxu2 }
 0x1b7   : > { %v791_v8 = vmax.f32 %v674_v11, 0.0  ;;  %v1100_v9 = vadd.f32 %v3092_v28, %v1099_v6  ;;  %v3258_v10 = vadd.f32 %v3213_v33, %v1521_v13 }
 0x1b9   : > { %v1249_v12 = vmax.f32 %v1100_v9, 0.0  ;;  %2507 = vmatmul.msk.f32.gmra.mxu1 %vm826_vm1, %v791_v8  ;;  %1709 = vmax.xlane.f32.xlu2 %v3258_v10 }
 0x1bb   : > { %2555 = vmatmul.msk.f32.gmra.mxu2 %vm826_vm1, %v1249_v12 }
 0x1bc   : > { %v676_v15 = vpop.f32.mrf.mxu0 }
 0x1bd   : > { %v677_v16 = vadd.f32 %v2999_v22, %v676_v15 }
 0x1be   : > { %v1102_v17 = vpop.f32.mrf.mxu1  ;;  %v1524_v18 = vpop.f32.mrf.mxu2 }
 0x1bf   : > { %v792_v19 = vmax.f32 %v677_v16, 0.0  ;;  %v1103_v20 = vadd.f32 %v3092_v28, %v1102_v17  ;;  %v3268_v21 = vadd.f32 %v3213_v33, %v1524_v18 }
 0x1c1   : > { %v1250_v24 = vmax.f32 %v1103_v20, 0.0  ;;  %2508 = vmatmul.msk.f32.gmra.mxu1 %vm826_vm1, %v792_v19  ;;  %1711 = vmax.xlane.f32.xlu2 %v3268_v21 }
 0x1c3   : > { %2556 = vmatmul.msk.f32.gmra.mxu2 %vm826_vm1, %v1250_v24 }
 0x1c4   : > { %v679_v25 = vpop.f32.mrf.mxu0 }
 0x1c5   : > { %v680_v26 = vadd.f32 %v2999_v22, %v679_v25 }
 0x1c6   : > { %v1105_v27 = vpop.f32.mrf.mxu1  ;;  %v1527_v29 = vpop.f32.mrf.mxu2 }
 0x1c7   : > { %v793_v30 = vmax.f32 %v680_v26, 0.0  ;;  %v1106_v31 = vadd.f32 %v3092_v28, %v1105_v27  ;;  %v3278_v32 = vadd.f32 %v3213_v33, %v1527_v29 }
 0x1c9   : > { %v1251_v35 = vmax.f32 %v1106_v31, 0.0  ;;  %2509 = vmatmul.msk.f32.gmra.mxu1 %vm826_vm1, %v793_v30  ;;  %1713 = vmax.xlane.f32.xlu0 %v3278_v32 }
 0x1cb   : > { %2557 = vmatmul.msk.f32.gmra.mxu2 %vm826_vm1, %v1251_v35  ;;  %v712_v35 = vpop.f32.mrf.mxu3 }
 0x1cc   : > { %v682_v36 = vpop.f32.mrf.mxu0 }
 0x1cd   : > { %v683_v37 = vadd.f32 %v2999_v22, %v682_v36 }
 0x1ce   : > { %v1108_v38 = vpop.f32.mrf.mxu1  ;;  %v1530_v39 = vpop.f32.mrf.mxu2 }
 0x1cf   : > { %v794_v41 = vmax.f32 %v683_v37, 0.0  ;;  %v1109_v42 = vadd.f32 %v3092_v28, %v1108_v38  ;;  %v3288_v43 = vadd.f32 %v3213_v33, %v1530_v39 }
 0x1d1   : > { %v1252_v45 = vmax.f32 %v1109_v42, 0.0  ;;  %2510 = vmatmul.msk.f32.gmra.mxu1 %vm826_vm1, %v794_v41  ;;  %1715 = vmax.xlane.f32.xlu1 %v3288_v43 }
 0x1d3   : > { %2558 = vmatmul.msk.f32.gmra.mxu2 %vm826_vm1, %v1252_v45 }
 0x1d4   : > { %v685_v46 = vpop.f32.mrf.mxu0 }
 0x1d5   : > { %v686_v47 = vadd.f32 %v2999_v22, %v685_v46 }
 0x1d6   : > { %v1111_v48 = vpop.f32.mrf.mxu1  ;;  %v1533_v50 = vpop.f32.mrf.mxu2 }
 0x1d7   : > { %v795_v51 = vmax.f32 %v686_v47, 0.0  ;;  %v1112_v52 = vadd.f32 %v3092_v28, %v1111_v48  ;;  %v3298_v53 = vadd.f32 %v3213_v33, %v1533_v50  ;;  %v715_v47 = vpop.f32.mrf.mxu3 }
 0x1d9   : > { %v1253_v55 = vmax.f32 %v1112_v52, 0.0  ;;  %2511 = vmatmul.msk.f32.gmra.mxu1 %vm826_vm1, %v795_v51  ;;  %1717 = vmax.xlane.f32.xlu2 %v3298_v53 }
 0x1db   : > { %2559 = vmatmul.msk.f32.gmra.mxu2 %vm826_vm1, %v1253_v55 }
 0x1dc   : > { %v688_v56 = vpop.f32.mrf.mxu0 }
 0x1dd   : > { %v689_v57 = vadd.f32 %v2999_v22, %v688_v56 }
 0x1de   : > { %v1114_v59 = vpop.f32.mrf.mxu1  ;;  %v1536_v60 = vpop.f32.mrf.mxu2 }
 0x1df   : > { %v796_v61 = vmax.f32 %v689_v57, 0.0  ;;  %v1115_v62 = vadd.f32 %v3092_v28, %v1114_v59  ;;  %v3308_v63 = vadd.f32 %v3213_v33, %v1536_v60 }
 0x1e1   : > { %v1254_v1 = vmax.f32 %v1115_v62, 0.0  ;;  %2512 = vmatmul.msk.f32.gmra.mxu1 %vm826_vm1, %v796_v61  ;;  %1719 = vmax.xlane.f32.xlu0 %v3308_v63 }
 0x1e3   : > { %2560 = vmatmul.msk.f32.gmra.mxu2 %vm826_vm1, %v1254_v1 }
 0x1e4   : > { %v691_v2 = vpop.f32.mrf.mxu0 }
 0x1e5   : > { %v692_v4 = vadd.f32 %v2999_v22, %v691_v2 }
 0x1e6   : > { %v1117_v5 = vpop.f32.mrf.mxu1  ;;  %v1539_v7 = vpop.f32.mrf.mxu2 }
 0x1e7   : > { %v797_v11 = vmax.f32 %v692_v4, 0.0  ;;  %v1118_v6 = vadd.f32 %v3092_v28, %v1117_v5  ;;  %v3318_v13 = vadd.f32 %v3213_v33, %v1539_v7  ;;  %v718_v5 = vpop.f32.mrf.mxu3 }
 0x1e9   : > { %v1255_v8 = vmax.f32 %v1118_v6, 0.0  ;;  %2513 = vmatmul.msk.f32.gmra.mxu1 %vm826_vm1, %v797_v11  ;;  %1721 = vmax.xlane.f32.xlu1 %v3318_v13  ;;  %v710_v11 = vadd.f32 %v2999_v22, %v709_v23 }
 0x1eb   : > { %2561 = vmatmul.msk.f32.gmra.mxu2 %vm826_vm1, %v1255_v8  ;;  %v803_v6 = vmax.f32 %v710_v11, 0.0 }
 0x1ec   : > { %v694_v9 = vpop.f32.mrf.mxu0 }
 0x1ed   : > { %v695_v14 = vadd.f32 %v2999_v22, %v694_v9 }
 0x1ee   : > { %v1120_v12 = vpop.f32.mrf.mxu1  ;;  %v1542_v15 = vpop.f32.mrf.mxu2 }
 0x1ef   : > { %v798_v16 = vmax.f32 %v695_v14, 0.0  ;;  %v1121_v17 = vadd.f32 %v3092_v28, %v1120_v12  ;;  %v3326_v18 = vadd.f32 %v3213_v33, %v1542_v15 }
 0x1f1   : > { %v1256_v19 = vmax.f32 %v1121_v17, 0.0  ;;  %2514 = vmatmul.msk.f32.gmra.mxu1 %vm826_vm1, %v798_v16  ;;  %1723 = vmax.xlane.f32.xlu2 %v3326_v18 }
 0x1f3   : > { %2562 = vmatmul.msk.f32.gmra.mxu2 %vm826_vm1, %v1256_v19  ;;  %v713_v19 = vadd.f32 %v2999_v22, %v712_v35 }
 0x1f4   : > { %v697_v20 = vpop.f32.mrf.mxu0 }
 0x1f5   : > { %v698_v24 = vadd.f32 %v2999_v22, %v697_v20  ;;  %v721_v20 = vpop.f32.mrf.mxu3 }
 0x1f6   : > { %v1123_v25 = vpop.f32.mrf.mxu1  ;;  %v1545_v26 = vpop.f32.mrf.mxu2 }
 0x1f7   : > { %v799_v27 = vmax.f32 %v698_v24, 0.0  ;;  %v1124_v29 = vadd.f32 %v3092_v28, %v1123_v25  ;;  %v3334_v30 = vadd.f32 %v3213_v33, %v1545_v26 }
 0x1f9   : > { %v1257_v31 = vmax.f32 %v1124_v29, 0.0  ;;  %2515 = vmatmul.msk.f32.gmra.mxu1 %vm826_vm1, %v799_v27  ;;  %1725 = vmax.xlane.f32.xlu0 %v3334_v30 }
 0x1fb   : > { %2563 = vmatmul.msk.f32.gmra.mxu2 %vm826_vm1, %v1257_v31 }
 0x1fc   : > { %v700_v34 = vpop.f32.mrf.mxu0 }
 0x1fd   : > { %v701_v36 = vadd.f32 %v2999_v22, %v700_v34 }
 0x1fe   : > { %v1126_v37 = vpop.f32.mrf.mxu1  ;;  %v1548_v38 = vpop.f32.mrf.mxu2 }
 0x1ff   : > { %v800_v39 = vmax.f32 %v701_v36, 0.0  ;;  %v1127_v41 = vadd.f32 %v3092_v28, %v1126_v37  ;;  %v3342_v42 = vadd.f32 %v3213_v33, %v1548_v38  ;;  %v724_v36 = vpop.f32.mrf.mxu3 }
 0x201   : > { %v1258_v44 = vmax.f32 %v1127_v41, 0.0  ;;  %2516 = vmatmul.msk.f32.gmra.mxu1 %vm826_vm1, %v800_v39  ;;  %1727 = vmax.xlane.f32.xlu1 %v3342_v42 }
 0x203   : > { %2564 = vmatmul.msk.f32.gmra.mxu2 %vm826_vm1, %v1258_v44 }
 0x204   : > { %v703_v45 = vpop.f32.mrf.mxu0 }
 0x205   : > { %v704_v46 = vadd.f32 %v2999_v22, %v703_v45 }
 0x206   : > { %v1129_v48 = vpop.f32.mrf.mxu1  ;;  %v1551_v50 = vpop.f32.mrf.mxu2 }
 0x207   : > { %v801_v51 = vmax.f32 %v704_v46, 0.0  ;;  %v1130_v52 = vadd.f32 %v3092_v28, %v1129_v48  ;;  %v3350_v54 = vadd.f32 %v3213_v33, %v1551_v50 }
 0x209   : > { %v1259_v55 = vmax.f32 %v1130_v52, 0.0  ;;  %2517 = vmatmul.msk.f32.gmra.mxu1 %vm826_vm1, %v801_v51  ;;  %1729 = vmax.xlane.f32.xlu2 %v3350_v54 }
 0x20b   : > { %2565 = vmatmul.msk.f32.gmra.mxu2 %vm826_vm1, %v1259_v55 }
 0x20c   : > { %v706_v56 = vpop.f32.mrf.mxu0  ;;  %v1702_v57 = vpop.xlane.xlu0 %1701 }
 0x20d   : > { %v707_v59 = vadd.f32 %v2999_v22, %v706_v56  ;;  %v1829_v60 = vsub.f32 %v3218_v40, %v1702_v57  ;;  %v727_v56 = vpop.f32.mrf.mxu3 }
 0x20e   : > { %v1132_v61 = vpop.f32.mrf.mxu1  ;;  %v1554_v62 = vpop.f32.mrf.mxu2 }
 0x20f   : > { %v802_v0 = vmax.f32 %v707_v59, 0.0  ;;  %v1893_v1 = vmul.f32 1.442695, %v1829_v60  ;;  %v1133_v2 = vadd.f32 %v3092_v28, %v1132_v61  ;;  %v3359_v4 = vadd.f32 %v3213_v33, %v1554_v62 }
 0x211   : > { %2621 = vpow2.f32 %v1893_v1  ;;  %v1260_v7 = vmax.f32 %v1133_v2, 0.0  ;;  %2518 = vmatmul.msk.f32.vlgmr.msrb.gmra.mxu3 %vm826_vm1, %v802_v0  ;;  %1731 = vmax.xlane.f32.xlu0 %v3359_v4 }
 0x213   : > { %2566 = vmatmul.msk.f32.gmra.mxu2 %vm826_vm1, %v1260_v7 }
 0x214   : > { %v1704_v40 = vpop.xlane.xlu0 %1703 }
 0x215   : > { %v1830_v8 = vsub.f32 %v3228_v49, %v1704_v40  ;;  %v804_v49 = vmax.f32 %v713_v19, 0.0 }
 0x216   : > { %v1135_v9 = vpop.f32.mrf.mxu1  ;;  %v1557_v14 = vpop.f32.mrf.mxu2 }
 0x217   : > { %v3366_v12 = vpop.eup %2621  ;;  %v1895_v15 = vmul.f32 1.442695, %v1830_v8  ;;  %v1136_v16 = vadd.f32 %v3092_v28, %v1135_v9  ;;  %v3375_v27 = vadd.f32 %v3213_v33, %v1557_v14 }
 0x218   : > { %2021 = vadd.xlane.f32.xlu1 %v3366_v12 }
 0x219   : > { %2623 = vpow2.f32 %v1895_v15  ;;  %v1261_v17 = vmax.f32 %v1136_v16, 0.0  ;;  %2519 = vmatmul.msk.f32.gmra.mxu3 %vm826_vm1, %v803_v6  ;;  %v730_v15 = vpop.f32.mrf.mxu3 }
 0x21b   : > { %2567 = vmatmul.msk.f32.gmra.mxu2 %vm826_vm1, %v1261_v17 }
 0x21c   : > { %v1706_v23 = vpop.xlane.xlu1 %1705 }
 0x21d   : > { %v1831_v24 = vsub.f32 %v3238_v58, %v1706_v23  ;;  %v3386_v58 = vld [vmem:[%s4058_s2] ss:$0 sm:$0xff] }
 0x21e   : > { %v1138_v25 = vpop.f32.mrf.mxu1  ;;  %v1560_v26 = vpop.f32.mrf.mxu2  ;;  %v716_v35 = vadd.f32 %v3386_v58, %v715_v47 }
 0x21f   : > { %v3377_v29 = vpop.eup %2623  ;;  %v1897_v31 = vmul.f32 1.442695, %v1831_v24  ;;  %v1139_v34 = vadd.f32 %v3092_v28, %v1138_v25  ;;  %v3392_v45 = vadd.f32 %v3213_v33, %v1560_v26 }
 0x220   : > { %1733 = vmax.xlane.f32.xlu1 %v3375_v27  ;;  %2023 = vadd.xlane.f32.xlu2 %v3377_v29  ;;  %v805_v38 = vmax.f32 %v716_v35, 0.0 }
 0x221   : > { %2625 = vpow2.f32 %v1897_v31  ;;  %v1262_v22 = vmax.f32 %v1139_v34, 0.0  ;;  %2520 = vmatmul.msk.f32.gmra.mxu3 %vm826_vm1, %v804_v49 }
 0x223   : > { %2568 = vmatmul.msk.f32.gmra.mxu2 %vm826_vm1, %v1262_v22  ;;  %v733_v22 = vpop.f32.mrf.mxu3 }
 0x224   : > { %v1708_v37 = vpop.xlane.xlu1 %1707 }
 0x225   : > { %v1832_v39 = vsub.f32 %v3248_v3, %v1708_v37  ;;  %v719_v3 = vadd.f32 %v3386_v58, %v718_v5 }
 0x226   : > { %v1141_v41 = vpop.f32.mrf.mxu1  ;;  %v1563_v44 = vpop.f32.mrf.mxu2 }
 0x227   : > { %v3394_v46 = vpop.eup %2625  ;;  %v1899_v48 = vmul.f32 1.442695, %v1832_v39  ;;  %v1142_v50 = vadd.f32 %v3092_v28, %v1141_v41  ;;  %v806_v52 = vmax.f32 %v719_v3, 0.0  ;;  %v3404_v60 = vadd.f32 %v3213_v33, %v1563_v44 }
 0x228   : > { %2025 = vadd.xlane.f32.xlu0 %v3394_v46  ;;  %1735 = vmax.xlane.f32.xlu2 %v3392_v45 }
 0x229   : > { %2627 = vpow2.f32 %v1899_v48  ;;  %v1263_v47 = vmax.f32 %v1142_v50, 0.0  ;;  %2521 = vmatmul.msk.f32.gmra.mxu3 %vm826_vm1, %v805_v38 }
 0x22b   : > { %2569 = vmatmul.msk.f32.gmra.mxu2 %vm826_vm1, %v1263_v47  ;;  %v736_v3 = vpop.f32.mrf.mxu3 }
 0x22c   : > { %v1710_v51 = vpop.xlane.xlu2 %1709 }
 0x22d   : > { %v1833_v55 = vsub.f32 %v3258_v10, %v1710_v51  ;;  %v722_v10 = vadd.f32 %v3386_v58, %v721_v20 }
 0x22e   : > { %v1144_v57 = vpop.f32.mrf.mxu1  ;;  %v1566_v59 = vpop.f32.mrf.mxu2 }
 0x22f   : > { %v3406_v61 = vpop.eup %2627  ;;  %v1901_v62 = vmul.f32 1.442695, %v1833_v55  ;;  %v1145_v0 = vadd.f32 %v3092_v28, %v1144_v57  ;;  %v807_v5 = vmax.f32 %v722_v10, 0.0  ;;  %v3416_v6 = vadd.f32 %v3213_v33, %v1566_v59 }
 0x230   : > { %1737 = vmax.xlane.f32.xlu0 %v3404_v60  ;;  %2027 = vadd.xlane.f32.xlu1 %v3406_v61  ;;  %v734_v10 = vadd.f32 %v3386_v58, %v733_v22 }
 0x231   : > { %2629 = vpow2.f32 %v1901_v62  ;;  %v1264_v1 = vmax.f32 %v1145_v0, 0.0  ;;  %2522 = vmatmul.msk.f32.gmra.mxu3 %vm826_vm1, %v806_v52  ;;  %v3459_v0 = vld [vmem:[%s4060_s4] ss:$0 sm:$0xff] }
 0x233   : > { %2570 = vmatmul.msk.f32.gmra.mxu2 %vm826_vm1, %v1264_v1 }
 0x234   : > { %v1712_v2 = vpop.xlane.xlu2 %1711 }
 0x235   : > { %v1834_v7 = vsub.f32 %v3268_v21, %v1712_v2  ;;  %v725_v21 = vadd.f32 %v3386_v58, %v724_v36 }
 0x236   : > { %v1147_v11 = vpop.f32.mrf.mxu1  ;;  %v1569_v40 = vpop.f32.mrf.mxu2 }
 0x237   : > { %v3418_v8 = vpop.eup %2629  ;;  %v1903_v9 = vmul.f32 1.442695, %v1834_v7  ;;  %v1148_v14 = vadd.f32 %v3092_v28, %v1147_v11  ;;  %v808_v19 = vmax.f32 %v725_v21, 0.0  ;;  %v3428_v24 = vadd.f32 %v3213_v33, %v1569_v40  ;;  %v739_v11 = vpop.f32.mrf.mxu3 }
 0x238   : > { %1739 = vmax.xlane.f32.xlu1 %v3416_v6  ;;  %2029 = vadd.xlane.f32.xlu2 %v3418_v8 }
 0x239   : > { %2631 = vpow2.f32 %v1903_v9  ;;  %v1265_v16 = vmax.f32 %v1148_v14, 0.0  ;;  %2523 = vmatmul.msk.f32.gmra.mxu3 %vm826_vm1, %v807_v5  ;;  %v811_v5 = vmax.f32 %v734_v10, 0.0 }
 0x23b   : > { %2571 = vmatmul.msk.f32.gmra.mxu2 %vm826_vm1, %v1265_v16 }
 0x23c   : > { %v1714_v17 = vpop.xlane.xlu0 %1713 }
 0x23d   : > { %v1835_v20 = vsub.f32 %v3278_v32, %v1714_v17  ;;  %v728_v32 = vadd.f32 %v3386_v58, %v727_v56 }
 0x23e   : > { %v1150_v23 = vpop.f32.mrf.mxu1  ;;  %v1572_v49 = vpop.f32.mrf.mxu2 }
 0x23f   : > { %v3430_v25 = vpop.eup %2631  ;;  %v1905_v26 = vmul.f32 1.442695, %v1835_v20  ;;  %v1151_v31 = vadd.f32 %v3092_v28, %v1150_v23  ;;  %v809_v36 = vmax.f32 %v728_v32, 0.0  ;;  %v3440_v41 = vadd.f32 %v3213_v33, %v1572_v49 }
 0x240   : > { %2031 = vadd.xlane.f32.xlu0 %v3430_v25  ;;  %1741 = vmax.xlane.f32.xlu2 %v3428_v24 }
 0x241   : > { %2633 = vpow2.f32 %v1905_v26  ;;  %v1266_v34 = vmax.f32 %v1151_v31, 0.0  ;;  %2524 = vmatmul.msk.f32.gmra.mxu3 %vm826_vm1, %v808_v19 }
 0x243   : > { %2572 = vmatmul.msk.f32.gmra.mxu2 %vm826_vm1, %v1266_v34 }
 0x244   : > { %v1716_v35 = vpop.xlane.xlu1 %1715 }
 0x245   : > { %v1836_v37 = vsub.f32 %v3288_v43, %v1716_v35  ;;  %v731_v43 = vadd.f32 %v3386_v58, %v730_v15  ;;  %v742_v35 = vpop.f32.mrf.mxu3 }
 0x246   : > { %v1153_v38 = vpop.f32.mrf.mxu1  ;;  %v1575_v39 = vpop.f32.mrf.mxu2 }
 0x247   : > { %v3442_v44 = vpop.eup %2633  ;;  %v1907_v48 = vmul.f32 1.442695, %v1836_v37  ;;  %v1154_v50 = vadd.f32 %v3092_v28, %v1153_v38  ;;  %v810_v52 = vmax.f32 %v731_v43, 0.0  ;;  %v3452_v28 = vadd.f32 %v3213_v33, %v1575_v39 }
 0x248   : > { %1743 = vmax.xlane.f32.xlu0 %v3440_v41  ;;  %2033 = vadd.xlane.f32.xlu1 %v3442_v44 }
 0x249   : > { %2635 = vpow2.f32 %v1907_v48  ;;  %v1267_v47 = vmax.f32 %v1154_v50, 0.0  ;;  %2525 = vmatmul.msk.f32.gmra.mxu3 %vm826_vm1, %v809_v36 }
 0x24b   : > { %2573 = vmatmul.msk.f32.gmra.mxu2 %vm826_vm1, %v1267_v47 }
 0x24c   : > { %v1718_v51 = vpop.xlane.xlu2 %1717 }
 0x24d   : > { %v1837_v55 = vsub.f32 %v3298_v53, %v1718_v51 }
 0x24e   : > { %v1156_v56 = vpop.f32.mrf.mxu1  ;;  %v1578_v57 = vpop.f32.mrf.mxu2 }
 0x24f   : > { %v3454_v59 = vpop.eup %2635  ;;  %v1909_v62 = vmul.f32 1.442695, %v1837_v55  ;;  %v1157_v1 = vadd.f32 %v3459_v0, %v1156_v56  ;;  %v3469_v14 = vadd.f32 %v3213_v33, %v1578_v57  ;;  %v745_v55 = vpop.f32.mrf.mxu3 }
 0x250   : > { %2035 = vadd.xlane.f32.xlu2 %v3454_v59  ;;  %1745 = vmax.xlane.f32.xlu1 %v3452_v28 }
 0x251   : > { %2637 = vpow2.f32 %v1909_v62  ;;  %v1268_v53 = vmax.f32 %v1157_v1, 0.0  ;;  %2526 = vmatmul.msk.f32.gmra.mxu3 %vm826_vm1, %v810_v52 }
 0x253   : > { %2574 = vmatmul.msk.f32.gmra.mxu2 %vm826_vm1, %v1268_v53 }
 0x254   : > { %v1720_v2 = vpop.xlane.xlu0 %1719 }
 0x255   : > { %v1838_v7 = vsub.f32 %v3308_v63, %v1720_v2  ;;  %v737_v63 = vadd.f32 %v3386_v58, %v736_v3 }
 0x256   : > { %v1159_v40 = vpop.f32.mrf.mxu1  ;;  %v1581_v9 = vpop.f32.mrf.mxu2 }
 0x257   : > { %v3471_v15 = vpop.eup %2637  ;;  %v1911_v16 = vmul.f32 1.442695, %v1838_v7  ;;  %v1160_v21 = vadd.f32 %v3459_v0, %v1159_v40  ;;  %v812_v20 = vmax.f32 %v737_v63, 0.0  ;;  %v3481_v49 = vadd.f32 %v3213_v33, %v1581_v9  ;;  %v748_v40 = vpop.f32.mrf.mxu3 }
 0x258   : > { %2037 = vadd.xlane.f32.xlu0 %v3471_v15  ;;  %1747 = vmax.xlane.f32.xlu2 %v3469_v14 }
 0x259   : > { %2639 = vpow2.f32 %v1911_v16  ;;  %v1269_v17 = vmax.f32 %v1160_v21, 0.0  ;;  %2527 = vmatmul.msk.f32.gmra.mxu3 %vm826_vm1, %v811_v5 }
 0x25b   : > { %2575 = vmatmul.msk.f32.gmra.mxu2 %vm826_vm1, %v1269_v17 }
 0x25c   : > { %v1722_v19 = vpop.xlane.xlu1 %1721 }
 0x25d   : > { %v1839_v23 = vsub.f32 %v3318_v13, %v1722_v19  ;;  %v740_v13 = vadd.f32 %v3386_v58, %v739_v11 }
 0x25e   : > { %v1162_v26 = vpop.f32.mrf.mxu1  ;;  %v1584_v31 = vpop.f32.mrf.mxu2 }
 0x25f   : > { %v3483_v34 = vpop.eup %2639  ;;  %v1913_v32 = vmul.f32 1.442695, %v1839_v23  ;;  %v1163_v22 = vadd.f32 %v3459_v0, %v1162_v26  ;;  %v813_v38 = vmax.f32 %v740_v13, 0.0  ;;  %v3493_v48 = vadd.f32 %v3213_v33, %v1584_v31 }
 0x260   : > { %1749 = vmax.xlane.f32.xlu0 %v3481_v49  ;;  %2039 = vadd.xlane.f32.xlu1 %v3483_v34 }
 0x261   : > { %2641 = vpow2.f32 %v1913_v32  ;;  %v1270_v36 = vmax.f32 %v1163_v22, 0.0  ;;  %2528 = vmatmul.msk.f32.gmra.mxu3 %vm826_vm1, %v812_v20 }
 0x263   : > { %2576 = vmatmul.msk.f32.gmra.mxu2 %vm826_vm1, %v1270_v36  ;;  %v751_v36 = vpop.f32.mrf.mxu3 }
 0x264   : > { %v1724_v37 = vpop.xlane.xlu2 %1723 }
 0x265   : > { %v1840_v39 = vsub.f32 %v3326_v18, %v1724_v37  ;;  %v743_v18 = vadd.f32 %v3386_v58, %v742_v35 }
 0x266   : > { %v1165_v50 = vpop.f32.mrf.mxu1  ;;  %v1587_v47 = vpop.f32.mrf.mxu2 }
 0x267   : > { %v3495_v43 = vpop.eup %2641  ;;  %v1915_v3 = vmul.f32 1.442695, %v1840_v39  ;;  %v1166_v51 = vadd.f32 %v3459_v0, %v1165_v50  ;;  %v814_v57 = vmax.f32 %v743_v18, 0.0  ;;  %v3505_v1 = vadd.f32 %v3213_v33, %v1587_v47 }
 0x268   : > { %2041 = vadd.xlane.f32.xlu2 %v3495_v43  ;;  %1751 = vmax.xlane.f32.xlu1 %v3493_v48 }
 0x269   : > { %2643 = vpow2.f32 %v1915_v3  ;;  %v1271_v52 = vmax.f32 %v1166_v51, 0.0  ;;  %2529 = vmatmul.msk.f32.gmra.mxu3 %vm826_vm1, %v813_v38 }
 0x26b   : > { %2577 = vmatmul.msk.f32.gmra.mxu2 %vm826_vm1, %v1271_v52 }
 0x26c   : > { %v1726_v56 = vpop.xlane.xlu0 %1725 }
 0x26d   : > { %v1841_v62 = vsub.f32 %v3334_v30, %v1726_v56  ;;  %v746_v30 = vadd.f32 %v3386_v58, %v745_v55 }
 0x26e   : > { %v1168_v53 = vpop.f32.mrf.mxu1  ;;  %v1590_v10 = vpop.f32.mrf.mxu2 }
 0x26f   : > { %v3507_v2 = vpop.eup %2643  ;;  %v1917_v5 = vmul.f32 1.442695, %v1841_v62  ;;  %v1169_v7 = vadd.f32 %v3459_v0, %v1168_v53  ;;  %v815_v16 = vmax.f32 %v746_v30, 0.0  ;;  %v3517_v17 = vadd.f32 %v3213_v33, %v1590_v10 }
 0x270   : > { %2043 = vadd.xlane.f32.xlu0 %v3507_v2  ;;  %1753 = vmax.xlane.f32.xlu2 %v3505_v1 }
 0x271   : > { %2645 = vpow2.f32 %v1917_v5  ;;  %v1272_v11 = vmax.f32 %v1169_v7, 0.0  ;;  %2530 = vmatmul.msk.f32.gmra.mxu3 %vm826_vm1, %v814_v57 }
 0x273   : > { %2578 = vmatmul.msk.f32.gmra.mxu2 %vm826_vm1, %v1272_v11 }
 0x274   : > { %v1728_v9 = vpop.xlane.xlu1 %1727 }
 0x275   : > { %v1842_v21 = vsub.f32 %v3342_v42, %v1728_v9  ;;  %v749_v42 = vadd.f32 %v3386_v58, %v748_v40 }
 0x276   : > { %v1171_v63 = vpop.f32.mrf.mxu1  ;;  %v1593_v19 = vpop.f32.mrf.mxu2 }
 0x277   : > { %v3519_v20 = vpop.eup %2645  ;;  %v1919_v23 = vmul.f32 1.442695, %v1842_v21  ;;  %v1172_v26 = vadd.f32 %v3459_v0, %v1171_v63  ;;  %v816_v22 = vmax.f32 %v749_v42, 0.0  ;;  %v3529_v13 = vadd.f32 %v3213_v33, %v1593_v19 }
 0x278   : > { %1755 = vmax.xlane.f32.xlu0 %v3517_v17  ;;  %2045 = vadd.xlane.f32.xlu1 %v3519_v20 }
 0x279   : > { %2647 = vpow2.f32 %v1919_v23  ;;  %v1273_v31 = vmax.f32 %v1172_v26, 0.0  ;;  %2531 = vmatmul.msk.f32.gmra.mxu3 %vm826_vm1, %v815_v16 }
 0x27b   : > { %2579 = vmatmul.msk.f32.gmra.mxu2 %vm826_vm1, %v1273_v31 }
 0x27c   : > { %v1730_v32 = vpop.xlane.xlu2 %1729 }
 0x27d   : > { %v1843_v35 = vsub.f32 %v3350_v54, %v1730_v32  ;;  %v752_v54 = vadd.f32 %v3386_v58, %v751_v36 }
 0x27e   : > { %v1174_v37 = vpop.f32.mrf.mxu1  ;;  %v1596_v38 = vpop.f32.mrf.mxu2 }
 0x27f   : > { %v3531_v39 = vpop.eup %2647  ;;  %v1921_v50 = vmul.f32 1.442695, %v1843_v35  ;;  %v1175_v47 = vadd.f32 %v3459_v0, %v1174_v37  ;;  %v817_v52 = vmax.f32 %v752_v54, 0.0  ;;  %v3541_v55 = vadd.f32 %v3213_v33, %v1596_v38 }
 0x280   : > { %2047 = vadd.xlane.f32.xlu2 %v3531_v39  ;;  %1757 = vmax.xlane.f32.xlu1 %v3529_v13 }
 0x281   : > { %2649 = vpow2.f32 %v1921_v50  ;;  %v1274_v3 = vmax.f32 %v1175_v47, 0.0  ;;  %2532 = vmatmul.msk.f32.gmra.mxu3 %vm826_vm1, %v816_v22 }
 0x283   : > { %2580 = vmatmul.msk.f32.gmra.mxu2 %vm826_vm1, %v1274_v3 }
 0x284   : > { %v1732_v51 = vpop.xlane.xlu0 %1731 }
 0x285   : > { %v1844_v18 = vsub.f32 %v3359_v4, %v1732_v51 }
 0x286   : > { %v1177_v56 = vpop.f32.mrf.mxu1  ;;  %v1599_v57 = vpop.f32.mrf.mxu2 }
 0x287   : > { %v3543_v62 = vpop.eup %2649  ;;  %v1923_v53 = vmul.f32 1.442695, %v1844_v18  ;;  %v1178_v10 = vadd.f32 %v3459_v0, %v1177_v56  ;;  %v3551_v5 = vadd.f32 %v3213_v33, %v1599_v57 }
 0x288   : > { %2049 = vadd.xlane.f32.xlu0 %v3543_v62  ;;  %1759 = vmax.xlane.f32.xlu2 %v3541_v55 }
 0x289   : > { %2651 = vpow2.f32 %v1923_v53  ;;  %v1275_v58 = vmax.f32 %v1178_v10, 0.0  ;;  %2533 = vmatmul.msk.f32.gmra.mxu3 %vm826_vm1, %v817_v52 }
 0x28b   : > { %2581 = vmatmul.msk.f32.gmra.mxu2 %vm826_vm1, %v1275_v58  ;;  %v2022_v4 = vpop.xlane.xlu1 %2021 }
 0x28c   : > { %2653 = vrcp.f32 %v2022_v4 }
 0x28e   : > { %v1602_v7 = vpop.f32.mrf.mxu2 }
 0x28f   : > { %v3553_v11 = vpop.eup %2651  ;;  %v3569_v23 = vadd.f32 %v3213_v33, %v1602_v7 }
 0x290   : > { %1761 = vmax.xlane.f32.xlu0 %v3551_v5  ;;  %2051 = vadd.xlane.f32.xlu1 %v3553_v11 }
 0x292   : > { %v2654_v30 = vpop.eup %2653 }
 0x293   : > { %v2213_v40 = vmul.f32 %v2654_v30, %v3366_v12  ;;  %v1734_v9 = vpop.xlane.xlu1 %1733  ;;  %v2024_v16 = vpop.xlane.xlu2 %2023 }
 0x294   : > { %v1845_v21 = vsub.f32 %v3375_v27, %v1734_v9  ;;  %2655 = vrcp.f32 %v2024_v16  ;;  %v1180_v63 = vpop.f32.mrf.mxu3  ;;  %v3598_v9 = vld [vmem:[%s4062_s6] ss:$0 sm:$0xff] }
 0x295   : > { %2277 = vst [vmem:[%s3562_s20] sm:$0xff] %v2213_v40  ;;  %v1181_v19 = vadd.f32 %v3459_v0, %v1180_v63 }
 0x296   : > { %v1925_v26 = vmul.f32 1.442695, %v1845_v21  ;;  %v1605_v31 = vpop.f32.mrf.mxu2 }
 0x297   : > { %v1276_v42 = vmax.f32 %v1181_v19, 0.0  ;;  %v3584_v56 = vadd.f32 %v3213_v33, %v1605_v31 }
 0x298   : > { %2657 = vpow2.f32 %v1925_v26  ;;  %1763 = vmax.xlane.f32.xlu1 %v3569_v23 }
 0x299   : > { %2582 = vmatmul.msk.f32.vlgmr.msra.gmra.mxu3 %vm826_vm1, %v1276_v42 }
 0x29a   : > { %v2656_v12 = vpop.eup %2655 }
 0x29b   : > { %v2214_v27 = vmul.f32 %v2656_v12, %v3377_v29  ;;  %v1736_v32 = vpop.xlane.xlu2 %1735  ;;  %v2026_v22 = vpop.xlane.xlu0 %2025 }
 0x29c   : > { %v1846_v35 = vsub.f32 %v3392_v45, %v1736_v32  ;;  %2659 = vrcp.f32 %v2026_v22  ;;  %v1183_v36 = vpop.f32.mrf.mxu3 }
 0x29d   : > { %2278 = vst [vmem:[%s3562_s20 + $0x8] sm:$0xff] %v2214_v27  ;;  %v1184_v37 = vadd.f32 %v3459_v0, %v1183_v36 }
 0x29e   : > { %v3577_v38 = vpop.eup %2657  ;;  %v1927_v50 = vmul.f32 1.442695, %v1846_v35  ;;  %v1608_v47 = vpop.f32.mrf.mxu2 }
 0x29f   : > { %v1277_v3 = vmax.f32 %v1184_v37, 0.0  ;;  %2053 = vadd.xlane.f32.xlu2 %v3577_v38  ;;  %v3601_v16 = vadd.f32 %v3598_v9, %v1608_v47 }
 0x2a0   : > { %2661 = vpow2.f32 %v1927_v50 }
 0x2a1   : > { %2583 = vmatmul.msk.f32.gmra.mxu3 %vm826_vm1, %v1277_v3 }
 0x2a2   : > { %v2660_v29 = vpop.eup %2659 }
 0x2a3   : > { %v2215_v54 = vmul.f32 %v2660_v29, %v3394_v46  ;;  %v2028_v45 = vpop.xlane.xlu1 %2027  ;;  %v1738_v51 = vpop.xlane.xlu0 %1737 }
 0x2a4   : > { %2663 = vrcp.f32 %v2028_v45  ;;  %v1847_v52 = vsub.f32 %v3404_v60, %v1738_v51  ;;  %v1186_v18 = vpop.f32.mrf.mxu3 }
 0x2a5   : > { %2279 = vst [vmem:[%s3562_s20 + $0x10] sm:$0xff] %v2215_v54  ;;  %v1187_v57 = vadd.f32 %v3459_v0, %v1186_v18 }
 0x2a6   : > { %v3588_v53 = vpop.eup %2661  ;;  %v1929_v10 = vmul.f32 1.442695, %v1847_v52  ;;  %v1611_v58 = vpop.f32.mrf.mxu2 }
 0x2a7   : > { %v1278_v4 = vmax.f32 %v1187_v57, 0.0  ;;  %1765 = vmax.xlane.f32.xlu2 %v3584_v56  ;;  %2055 = vadd.xlane.f32.xlu0 %v3588_v53  ;;  %v3613_v22 = vadd.f32 %v3598_v9, %v1611_v58 }
 0x2a8   : > { %2665 = vpow2.f32 %v1929_v10 }
 0x2a9   : > { %2584 = vmatmul.msk.f32.gmra.mxu3 %vm826_vm1, %v1278_v4 }
 0x2aa   : > { %v2664_v46 = vpop.eup %2663 }
 0x2ab   : > { %v2216_v33 = vmul.f32 %v2664_v46, %v3406_v61  ;;  %v1740_v60 = vpop.xlane.xlu1 %1739  ;;  %v2030_v7 = vpop.xlane.xlu2 %2029 }
 0x2ac   : > { %v1848_v30 = vsub.f32 %v3416_v6, %v1740_v60  ;;  %2667 = vrcp.f32 %v2030_v7  ;;  %v1189_v40 = vpop.f32.mrf.mxu3 }
 0x2ad   : > { %2280 = vst [vmem:[%s3562_s20 + $0x18] sm:$0xff] %v2216_v33  ;;  %v1190_v21 = vadd.f32 %v3459_v0, %v1189_v40 }
 0x2ae   : > { %v3605_v63 = vpop.eup %2665  ;;  %v1931_v61 = vmul.f32 1.442695, %v1848_v30  ;;  %v1614_v19 = vpop.f32.mrf.mxu2 }
 0x2af   : > { %v1279_v26 = vmax.f32 %v1190_v21, 0.0  ;;  %1767 = vmax.xlane.f32.xlu0 %v3601_v16  ;;  %2057 = vadd.xlane.f32.xlu1 %v3605_v63  ;;  %v3625_v51 = vadd.f32 %v3598_v9, %v1614_v19 }
 0x2b0   : > { %2669 = vpow2.f32 %v1931_v61 }
 0x2b1   : > { %2585 = vmatmul.msk.f32.gmra.mxu3 %vm826_vm1, %v1279_v26 }
 0x2b2   : > { %v2668_v6 = vpop.eup %2667 }
 0x2b3   : > { %v2217_v31 = vmul.f32 %v2668_v6, %v3418_v8  ;;  %v1742_v42 = vpop.xlane.xlu2 %1741  ;;  %v2032_v12 = vpop.xlane.xlu0 %2031 }
 0x2b4   : > { %v1849_v27 = vsub.f32 %v3428_v24, %v1742_v42  ;;  %2671 = vrcp.f32 %v2032_v12  ;;  %v1192_v32 = vpop.f32.mrf.mxu3 }
 0x2b5   : > { %2281 = vst [vmem:[%s3562_s20 + $0x20] sm:$0xff] %v2217_v31  ;;  %v1193_v35 = vadd.f32 %v3459_v0, %v1192_v32 }
 0x2b6   : > { %v3617_v36 = vpop.eup %2669  ;;  %v1933_v37 = vmul.f32 1.442695, %v1849_v27  ;;  %v1617_v50 = vpop.f32.mrf.mxu2 }
 0x2b7   : > { %v1280_v47 = vmax.f32 %v1193_v35, 0.0  ;;  %2059 = vadd.xlane.f32.xlu2 %v3617_v36  ;;  %1769 = vmax.xlane.f32.xlu1 %v3613_v22  ;;  %v3637_v7 = vadd.f32 %v3598_v9, %v1617_v50 }
 0x2b8   : > { %2673 = vpow2.f32 %v1933_v37 }
 0x2b9   : > { %2586 = vmatmul.msk.f32.gmra.mxu3 %vm826_vm1, %v1280_v47 }
 0x2ba   : > { %v2672_v8 = vpop.eup %2671 }
 0x2bb   : > { %v2218_v24 = vmul.f32 %v2672_v8, %v3430_v25  ;;  %v2034_v3 = vpop.xlane.xlu1 %2033  ;;  %v1744_v29 = vpop.xlane.xlu0 %1743 }
 0x2bc   : > { %2675 = vrcp.f32 %v2034_v3  ;;  %v1850_v54 = vsub.f32 %v3440_v41, %v1744_v29  ;;  %v1195_v45 = vpop.f32.mrf.mxu3 }
 0x2bd   : > { %2282 = vst [vmem:[%s3562_s20 + $0x28] sm:$0xff] %v2218_v24  ;;  %v1196_v52 = vadd.f32 %v3459_v0, %v1195_v45 }
 0x2be   : > { %v3629_v18 = vpop.eup %2673  ;;  %v1935_v57 = vmul.f32 1.442695, %v1850_v54  ;;  %v1620_v10 = vpop.f32.mrf.mxu2 }
 0x2bf   : > { %v1281_v58 = vmax.f32 %v1196_v52, 0.0  ;;  %1771 = vmax.xlane.f32.xlu2 %v3625_v51  ;;  %2061 = vadd.xlane.f32.xlu0 %v3629_v18  ;;  %v3649_v12 = vadd.f32 %v3598_v9, %v1620_v10 }
 0x2c0   : > { %2677 = vpow2.f32 %v1935_v57 }
 0x2c1   : > { %2587 = vmatmul.msk.f32.gmra.mxu3 %vm826_vm1, %v1281_v58 }
 0x2c2   : > { %v2676_v25 = vpop.eup %2675 }
 0x2c3   : > { %v2219_v41 = vmul.f32 %v2676_v25, %v3442_v44  ;;  %v2036_v4 = vpop.xlane.xlu2 %2035  ;;  %v1746_v46 = vpop.xlane.xlu1 %1745 }
 0x2c4   : > { %2679 = vrcp.f32 %v2036_v4  ;;  %v1851_v33 = vsub.f32 %v3452_v28, %v1746_v46  ;;  %v1198_v60 = vpop.f32.mrf.mxu3 }
 0x2c5   : > { %2283 = vst [vmem:[%s3562_s20 + $0x30] sm:$0xff] %v2219_v41  ;;  %v1199_v30 = vadd.f32 %v3459_v0, %v1198_v60 }
 0x2c6   : > { %v3641_v40 = vpop.eup %2677  ;;  %v1937_v21 = vmul.f32 1.442695, %v1851_v33  ;;  %v1623_v61 = vpop.f32.mrf.mxu2 }
 0x2c7   : > { %v1282_v19 = vmax.f32 %v1199_v30, 0.0  ;;  %1773 = vmax.xlane.f32.xlu0 %v3637_v7  ;;  %2063 = vadd.xlane.f32.xlu1 %v3641_v40  ;;  %v3661_v29 = vadd.f32 %v3598_v9, %v1623_v61 }
 0x2c8   : > { %2681 = vpow2.f32 %v1937_v21 }
 0x2c9   : > { %2588 = vmatmul.msk.f32.gmra.mxu3 %vm826_vm1, %v1282_v19 }
 0x2ca   : > { %v2680_v44 = vpop.eup %2679 }
 0x2cb   : > { %v2220_v28 = vmul.f32 %v2680_v44, %v3454_v59  ;;  %v1748_v26 = vpop.xlane.xlu2 %1747  ;;  %v2038_v6 = vpop.xlane.xlu0 %2037 }
 0x2cc   : > { %v1852_v31 = vsub.f32 %v3469_v14, %v1748_v26  ;;  %2683 = vrcp.f32 %v2038_v6  ;;  %v1201_v42 = vpop.f32.mrf.mxu3 }
 0x2cd   : > { %2284 = vst [vmem:[%s3562_s20 + $0x38] sm:$0xff] %v2220_v28  ;;  %v1202_v27 = vadd.f32 %v3459_v0, %v1201_v42 }
 0x2ce   : > { %v3653_v32 = vpop.eup %2681  ;;  %v1939_v35 = vmul.f32 1.442695, %v1852_v31  ;;  %v1626_v37 = vpop.f32.mrf.mxu2 }
 0x2cf   : > { %v1283_v50 = vmax.f32 %v1202_v27, 0.0  ;;  %2065 = vadd.xlane.f32.xlu2 %v3653_v32  ;;  %1775 = vmax.xlane.f32.xlu1 %v3649_v12  ;;  %v3673_v46 = vadd.f32 %v3598_v9, %v1626_v37 }
 0x2d0   : > { %2685 = vpow2.f32 %v1939_v35 }
 0x2d1   : > { %2589 = vmatmul.msk.f32.gmra.mxu3 %vm826_vm1, %v1283_v50 }
 0x2d2   : > { %v2684_v59 = vpop.eup %2683 }
 0x2d3   : > { %v2221_v14 = vmul.f32 %v2684_v59, %v3471_v15  ;;  %v2040_v47 = vpop.xlane.xlu1 %2039  ;;  %v1750_v8 = vpop.xlane.xlu0 %1749 }
 0x2d4   : > { %2687 = vrcp.f32 %v2040_v47  ;;  %v1853_v24 = vsub.f32 %v3481_v49, %v1750_v8  ;;  %v1204_v3 = vpop.f32.mrf.mxu3 }
 0x2d5   : > { %2285 = vst [vmem:[%s3562_s20 + $0x40] sm:$0xff] %v2221_v14  ;;  %v1205_v54 = vadd.f32 %v3459_v0, %v1204_v3 }
 0x2d6   : > { %v3665_v45 = vpop.eup %2685  ;;  %v1941_v52 = vmul.f32 1.442695, %v1853_v24  ;;  %v1629_v57 = vpop.f32.mrf.mxu2 }
 0x2d7   : > { %v1284_v10 = vmax.f32 %v1205_v54, 0.0  ;;  %2067 = vadd.xlane.f32.xlu0 %v3665_v45  ;;  %1777 = vmax.xlane.f32.xlu2 %v3661_v29  ;;  %v3685_v6 = vadd.f32 %v3598_v9, %v1629_v57 }
 0x2d8   : > { %2689 = vpow2.f32 %v1941_v52 }
 0x2d9   : > { %2590 = vmatmul.msk.f32.gmra.mxu3 %vm826_vm1, %v1284_v10 }
 0x2da   : > { %v2688_v15 = vpop.eup %2687 }
 0x2db   : > { %v2222_v49 = vmul.f32 %v2688_v15, %v3483_v34  ;;  %v2042_v58 = vpop.xlane.xlu2 %2041  ;;  %v1752_v25 = vpop.xlane.xlu1 %1751 }
 0x2dc   : > { %2691 = vrcp.f32 %v2042_v58  ;;  %v1854_v41 = vsub.f32 %v3493_v48, %v1752_v25  ;;  %v1207_v4 = vpop.f32.mrf.mxu3 }
 0x2dd   : > { %2286 = vst [vmem:[%s3562_s20 + $0x48] sm:$0xff] %v2222_v49  ;;  %v1208_v33 = vadd.f32 %v3459_v0, %v1207_v4 }
 0x2de   : > { %v3677_v60 = vpop.eup %2689  ;;  %v1943_v30 = vmul.f32 1.442695, %v1854_v41  ;;  %v1632_v21 = vpop.f32.mrf.mxu2 }
 0x2df   : > { %v1285_v61 = vmax.f32 %v1208_v33, 0.0  ;;  %1779 = vmax.xlane.f32.xlu0 %v3673_v46  ;;  %2069 = vadd.xlane.f32.xlu1 %v3677_v60  ;;  %v3697_v8 = vadd.f32 %v3598_v9, %v1632_v21 }
 0x2e0   : > { %2693 = vpow2.f32 %v1943_v30 }
 0x2e1   : > { %2591 = vmatmul.msk.f32.gmra.mxu3 %vm826_vm1, %v1285_v61 }
 0x2e2   : > { %v2692_v34 = vpop.eup %2691 }
 0x2e3   : > { %v2223_v48 = vmul.f32 %v2692_v34, %v3495_v43  ;;  %v1754_v19 = vpop.xlane.xlu2 %1753  ;;  %v2044_v44 = vpop.xlane.xlu0 %2043 }
 0x2e4   : > { %v1855_v28 = vsub.f32 %v3505_v1, %v1754_v19  ;;  %2695 = vrcp.f32 %v2044_v44  ;;  %v1210_v26 = vpop.f32.mrf.mxu3 }
 0x2e5   : > { %2287 = vst [vmem:[%s3562_s20 + $0x50] sm:$0xff] %v2223_v48  ;;  %v1211_v31 = vadd.f32 %v3459_v0, %v1210_v26 }
 0x2e6   : > { %v3689_v42 = vpop.eup %2693  ;;  %v1945_v27 = vmul.f32 1.442695, %v1855_v28  ;;  %v1635_v35 = vpop.f32.mrf.mxu2 }
 0x2e7   : > { %v1286_v37 = vmax.f32 %v1211_v31, 0.0  ;;  %2071 = vadd.xlane.f32.xlu2 %v3689_v42  ;;  %1781 = vmax.xlane.f32.xlu1 %v3685_v6  ;;  %v3709_v25 = vadd.f32 %v3598_v9, %v1635_v35 }
 0x2e8   : > { %2697 = vpow2.f32 %v1945_v27 }
 0x2e9   : > { %2592 = vmatmul.msk.f32.gmra.mxu3 %vm826_vm1, %v1286_v37 }
 0x2ea   : > { %v2696_v43 = vpop.eup %2695 }
 0x2eb   : > { %v2224_v1 = vmul.f32 %v2696_v43, %v3507_v2  ;;  %v2046_v50 = vpop.xlane.xlu1 %2045  ;;  %v1756_v59 = vpop.xlane.xlu0 %1755 }
 0x2ec   : > { %2699 = vrcp.f32 %v2046_v50  ;;  %v1856_v14 = vsub.f32 %v3517_v17, %v1756_v59  ;;  %v1213_v47 = vpop.f32.mrf.mxu3 }
 0x2ed   : > { %2288 = vst [vmem:[%s3562_s20 + $0x58] sm:$0xff] %v2224_v1  ;;  %v1214_v24 = vadd.f32 %v3459_v0, %v1213_v47 }
 0x2ee   : > { %v3701_v3 = vpop.eup %2697  ;;  %v1947_v54 = vmul.f32 1.442695, %v1856_v14  ;;  %v1638_v2 = vpop.f32.mrf.mxu2 }
 0x2ef   : > { %v1287_v52 = vmax.f32 %v1214_v24, 0.0  ;;  %2073 = vadd.xlane.f32.xlu0 %v3701_v3  ;;  %1783 = vmax.xlane.f32.xlu2 %v3697_v8  ;;  %v3721_v44 = vadd.f32 %v3598_v9, %v1638_v2 }
 0x2f0   : > { %2701 = vpow2.f32 %v1947_v54 }
 0x2f1   : > { %2593 = vmatmul.msk.f32.gmra.mxu3 %vm826_vm1, %v1287_v52 }
 0x2f2   : > { %v2700_v17 = vpop.eup %2699 }
 0x2f3   : > { %v2225_v57 = vmul.f32 %v2700_v17, %v3519_v20  ;;  %v2048_v10 = vpop.xlane.xlu2 %2047  ;;  %v1758_v15 = vpop.xlane.xlu1 %1757 }
 0x2f4   : > { %2703 = vrcp.f32 %v2048_v10  ;;  %v1857_v49 = vsub.f32 %v3529_v13, %v1758_v15  ;;  %v1216_v58 = vpop.f32.mrf.mxu3 }
 0x2f5   : > { %2289 = vst [vmem:[%s3562_s20 + $0x60] sm:$0xff] %v2225_v57  ;;  %v1217_v41 = vadd.f32 %v3459_v0, %v1216_v58 }
 0x2f6   : > { %v3713_v4 = vpop.eup %2701  ;;  %v1949_v33 = vmul.f32 1.442695, %v1857_v49  ;;  %v1641_v13 = vpop.f32.mrf.mxu2 }
 0x2f7   : > { %v1288_v30 = vmax.f32 %v1217_v41, 0.0  ;;  %1785 = vmax.xlane.f32.xlu0 %v3709_v25  ;;  %2075 = vadd.xlane.f32.xlu1 %v3713_v4  ;;  %v3733_v50 = vadd.f32 %v3598_v9, %v1641_v13 }
 0x2f8   : > { %2705 = vpow2.f32 %v1949_v33 }
 0x2f9   : > { %2594 = vmatmul.msk.f32.gmra.mxu3 %vm826_vm1, %v1288_v30 }
 0x2fa   : > { %v2704_v20 = vpop.eup %2703 }
 0x2fb   : > { %v2226_v21 = vmul.f32 %v2704_v20, %v3531_v39  ;;  %v1760_v61 = vpop.xlane.xlu2 %1759  ;;  %v2050_v34 = vpop.xlane.xlu0 %2049 }
 0x2fc   : > { %v1858_v48 = vsub.f32 %v3541_v55, %v1760_v61  ;;  %2707 = vrcp.f32 %v2050_v34  ;;  %v1219_v19 = vpop.f32.mrf.mxu3 }
 0x2fd   : > { %2290 = vst [vmem:[%s3562_s20 + $0x68] sm:$0xff] %v2226_v21  ;;  %v1220_v28 = vadd.f32 %v3459_v0, %v1219_v19 }
 0x2fe   : > { %v3725_v26 = vpop.eup %2705  ;;  %v1951_v31 = vmul.f32 1.442695, %v1858_v48  ;;  %v1644_v59 = vpop.f32.mrf.mxu2 }
 0x2ff   : > { %v1289_v27 = vmax.f32 %v1220_v28, 0.0  ;;  %2077 = vadd.xlane.f32.xlu2 %v3725_v26  ;;  %1787 = vmax.xlane.f32.xlu1 %v3721_v44  ;;  %v3745_v57 = vadd.f32 %v3598_v9, %v1644_v59 }
 0x300   : > { %2709 = vpow2.f32 %v1951_v31 }
 0x301   : > { %2595 = vmatmul.msk.f32.gmra.mxu3 %vm826_vm1, %v1289_v27 }
 0x302   : > { %v2708_v39 = vpop.eup %2707 }
 0x303   : > { %v2227_v55 = vmul.f32 %v2708_v39, %v3543_v62  ;;  %v2052_v35 = vpop.xlane.xlu1 %2051  ;;  %v1762_v37 = vpop.xlane.xlu0 %1761 }
 0x304   : > { %2711 = vrcp.f32 %v2052_v35  ;;  %v1859_v43 = vsub.f32 %v3551_v5, %v1762_v37  ;;  %v1222_v1 = vpop.f32.mrf.mxu3 }
 0x305   : > { %2291 = vst [vmem:[%s3562_s20 + $0x70] sm:$0xff] %v2227_v55  ;;  %v1223_v14 = vadd.f32 %v3459_v0, %v1222_v1 }
 0x306   : > { %v3737_v47 = vpop.eup %2709  ;;  %v1953_v24 = vmul.f32 1.442695, %v1859_v43  ;;  %v1647_v58 = vpop.f32.mrf.mxu2 }
 0x307   : > { %v1290_v54 = vmax.f32 %v1223_v14, 0.0  ;;  %2079 = vadd.xlane.f32.xlu0 %v3737_v47  ;;  %1789 = vmax.xlane.f32.xlu2 %v3733_v50 }
 0x308   : > { %2713 = vpow2.f32 %v1953_v24 }
 0x309   : > { %2596 = vmatmul.msk.f32.gmra.mxu3 %vm826_vm1, %v1290_v54 }
 0x30a   : > { %v2712_v62 = vpop.eup %2711 }
 0x30b   : > { %v2228_v5 = vmul.f32 %v2712_v62, %v3553_v11  ;;  %v1764_v52 = vpop.xlane.xlu1 %1763 }
 0x30c   : > { %v1860_v2 = vsub.f32 %v3569_v23, %v1764_v52  ;;  %v1225_v17 = vpop.f32.mrf.mxu3  ;;  %v3755_v23 = vadd.f32 %v3598_v9, %v1647_v58 }
 0x30d   : > { %2292 = vst [vmem:[%s3562_s20 + $0x78] sm:$0xff] %v2228_v5  ;;  %v1226_v10 = vadd.f32 %v3459_v0, %v1225_v17 }
 0x30e   : > { %v3749_v15 = vpop.eup %2713  ;;  %v1955_v49 = vmul.f32 1.442695, %v1860_v2  ;;  %v1650_v30 = vpop.f32.mrf.mxu2 }
 0x30f   : > { %v1291_v41 = vmax.f32 %v1226_v10, 0.0  ;;  %1791 = vmax.xlane.f32.xlu0 %v3745_v57  ;;  %2081 = vadd.xlane.f32.xlu1 %v3749_v15  ;;  %v3765_v48 = vadd.f32 %v3598_v9, %v1650_v30 }
 0x310   : > { %2715 = vpow2.f32 %v1955_v49 }
 0x311   : > { %2597 = vmatmul.msk.f32.gmra.mxu3 %vm826_vm1, %v1291_v41 }
 0x312   : > { %v2054_v11 = vpop.xlane.xlu2 %2053 }
 0x313   : > { %2717 = vrcp.f32 %v2054_v11 }
 0x316   : > { %v3757_v33 = vpop.eup %2715 }
 0x317   : > { %2083 = vadd.xlane.f32.xlu2 %v3757_v33  ;;  %1793 = vmax.xlane.f32.xlu1 %v3755_v23 }
 0x319   : > { %v2718_v0 = vpop.eup %2717 }
 0x31a   : > { %v2229_v20 = vmul.f32 %v2718_v0, %v3577_v38  ;;  %v1766_v13 = vpop.xlane.xlu2 %1765  ;;  %v2056_v21 = vpop.xlane.xlu0 %2055 }
 0x31b   : > { %v1861_v61 = vsub.f32 %v3584_v56, %v1766_v13  ;;  %2719 = vrcp.f32 %v2056_v21 }
 0x31c   : > { %2293 = vst [vmem:[%s3562_s20 + $0x80] sm:$0xff] %v2229_v20  ;;  %v1653_v34 = vpop.f32.mrf.mxu3 }
 0x31d   : > { %v1957_v19 = vmul.f32 1.442695, %v1861_v61  ;;  %v3777_v14 = vadd.f32 %v3598_v9, %v1653_v34 }
 0x31f   : > { %2721 = vpow2.f32 %v1957_v19  ;;  %1795 = vmax.xlane.f32.xlu2 %v3765_v48 }
 0x321   : > { %v2720_v28 = vpop.eup %2719 }
 0x322   : > { %v2230_v31 = vmul.f32 %v2720_v28, %v3588_v53  ;;  %v2058_v27 = vpop.xlane.xlu1 %2057  ;;  %v1768_v38 = vpop.xlane.xlu0 %1767 }
 0x323   : > { %2723 = vrcp.f32 %v2058_v27  ;;  %v1862_v39 = vsub.f32 %v3601_v16, %v1768_v38 }
 0x324   : > { %2294 = vst [vmem:[%s3562_s20 + $0x88] sm:$0xff] %v2230_v31  ;;  %v1656_v56 = vpop.f32.mrf.mxu3 }
 0x325   : > { %v3771_v55 = vpop.eup %2721  ;;  %v1959_v35 = vmul.f32 1.442695, %v1862_v39  ;;  %v3787_v2 = vadd.f32 %v3598_v9, %v1656_v56 }
 0x326   : > { %2085 = vadd.xlane.f32.xlu0 %v3771_v55 }
 0x327   : > { %2725 = vpow2.f32 %v1959_v35 }
 0x329   : > { %v2724_v37 = vpop.eup %2723 }
 0x32a   : > { %v2231_v43 = vmul.f32 %v2724_v37, %v3605_v63  ;;  %v2060_v1 = vpop.xlane.xlu2 %2059  ;;  %v1770_v59 = vpop.xlane.xlu1 %1769 }
 0x32b   : > { %2727 = vrcp.f32 %v2060_v1  ;;  %v1863_v53 = vsub.f32 %v3613_v22, %v1770_v59 }
 0x32c   : > { %2295 = vst [vmem:[%s3562_s20 + $0x90] sm:$0xff] %v2231_v43  ;;  %v1659_v16 = vpop.f32.mrf.mxu3 }
 0x32d   : > { %v3780_v24 = vpop.eup %2725  ;;  %v1961_v54 = vmul.f32 1.442695, %v1863_v53  ;;  %v3797_v0 = vadd.f32 %v3598_v9, %v1659_v16 }
 0x32e   : > { %1797 = vmax.xlane.f32.xlu0 %v3777_v14  ;;  %2087 = vadd.xlane.f32.xlu1 %v3780_v24 }
 0x32f   : > { %2729 = vpow2.f32 %v1961_v54 }
 0x331   : > { %v2728_v63 = vpop.eup %2727 }
 0x332   : > { %v2232_v62 = vmul.f32 %v2728_v63, %v3617_v36  ;;  %v1772_v5 = vpop.xlane.xlu2 %1771  ;;  %v2062_v52 = vpop.xlane.xlu0 %2061 }
 0x333   : > { %v1864_v22 = vsub.f32 %v3625_v51, %v1772_v5  ;;  %2731 = vrcp.f32 %v2062_v52 }
 0x334   : > { %2296 = vst [vmem:[%s3562_s20 + $0x98] sm:$0xff] %v2232_v62  ;;  %v1662_v17 = vpop.f32.mrf.mxu3 }
 0x335   : > { %v3790_v10 = vpop.eup %2729  ;;  %v1963_v49 = vmul.f32 1.442695, %v1864_v22  ;;  %v3807_v19 = vadd.f32 %v3598_v9, %v1662_v17 }
 0x336   : > { %2089 = vadd.xlane.f32.xlu2 %v3790_v10  ;;  %1799 = vmax.xlane.f32.xlu1 %v3787_v2 }
 0x337   : > { %2733 = vpow2.f32 %v1963_v49 }
 0x339   : > { %v2732_v36 = vpop.eup %2731 }
 0x33a   : > { %v2233_v58 = vmul.f32 %v2732_v36, %v3629_v18  ;;  %v2064_v41 = vpop.xlane.xlu1 %2063  ;;  %v1774_v51 = vpop.xlane.xlu0 %1773 }
 0x33b   : > { %2735 = vrcp.f32 %v2064_v41  ;;  %v1865_v11 = vsub.f32 %v3637_v7, %v1774_v51 }
 0x33c   : > { %2297 = vst [vmem:[%s3562_s20 + $0xa0] sm:$0xff] %v2233_v58  ;;  %v1665_v30 = vpop.f32.mrf.mxu3 }
 0x33d   : > { %v3800_v20 = vpop.eup %2733  ;;  %v1965_v13 = vmul.f32 1.442695, %v1865_v11  ;;  %v3817_v35 = vadd.f32 %v3598_v9, %v1665_v30 }
 0x33e   : > { %2091 = vadd.xlane.f32.xlu0 %v3800_v20  ;;  %1801 = vmax.xlane.f32.xlu2 %v3797_v0 }
 0x33f   : > { %2737 = vpow2.f32 %v1965_v13 }
 0x341   : > { %v2736_v18 = vpop.eup %2735 }
 0x342   : > { %v2234_v21 = vmul.f32 %v2736_v18, %v3641_v40  ;;  %v2066_v61 = vpop.xlane.xlu2 %2065  ;;  %v1776_v34 = vpop.xlane.xlu1 %1775 }
 0x343   : > { %2739 = vrcp.f32 %v2066_v61  ;;  %v1866_v7 = vsub.f32 %v3649_v12, %v1776_v34 }
 0x344   : > { %2298 = vst [vmem:[%s3562_s20 + $0xa8] sm:$0xff] %v2234_v21  ;;  %v1668_v28 = vpop.f32.mrf.mxu3 }
 0x345   : > { %v3810_v31 = vpop.eup %2737  ;;  %v1967_v27 = vmul.f32 1.442695, %v1866_v7  ;;  %v3827_v54 = vadd.f32 %v3598_v9, %v1668_v28 }
 0x346   : > { %1803 = vmax.xlane.f32.xlu0 %v3807_v19  ;;  %2093 = vadd.xlane.f32.xlu1 %v3810_v31 }
 0x347   : > { %2741 = vpow2.f32 %v1967_v27 }
 0x349   : > { %v2740_v40 = vpop.eup %2739 }
 0x34a   : > { %v2235_v38 = vmul.f32 %v2740_v40, %v3653_v32  ;;  %v1778_v39 = vpop.xlane.xlu2 %1777  ;;  %v2068_v56 = vpop.xlane.xlu0 %2067 }
 0x34b   : > { %v1867_v12 = vsub.f32 %v3661_v29, %v1778_v39  ;;  %2743 = vrcp.f32 %v2068_v56 }
 0x34c   : > { %2299 = vst [vmem:[%s3562_s20 + $0xb0] sm:$0xff] %v2235_v38  ;;  %v1671_v37 = vpop.f32.mrf.mxu3 }
 0x34d   : > { %v3820_v43 = vpop.eup %2741  ;;  %v1969_v1 = vmul.f32 1.442695, %v1867_v12  ;;  %v3837_v49 = vadd.f32 %v3598_v9, %v1671_v37 }
 0x34e   : > { %2095 = vadd.xlane.f32.xlu2 %v3820_v43  ;;  %1805 = vmax.xlane.f32.xlu1 %v3817_v35 }
 0x34f   : > { %2745 = vpow2.f32 %v1969_v1 }
 0x351   : > { %v2744_v32 = vpop.eup %2743 }
 0x352   : > { %v2236_v59 = vmul.f32 %v2744_v32, %v3665_v45  ;;  %v2070_v53 = vpop.xlane.xlu1 %2069  ;;  %v1780_v29 = vpop.xlane.xlu0 %1779 }
 0x353   : > { %2747 = vrcp.f32 %v2070_v53  ;;  %v1868_v16 = vsub.f32 %v3673_v46, %v1780_v29 }
 0x354   : > { %2300 = vst [vmem:[%s3562_s20 + $0xb8] sm:$0xff] %v2236_v59  ;;  %v1674_v63 = vpop.f32.mrf.mxu3 }
 0x355   : > { %v3830_v62 = vpop.eup %2745  ;;  %v1971_v5 = vmul.f32 1.442695, %v1868_v16  ;;  %v3847_v13 = vadd.f32 %v3598_v9, %v1674_v63 }
 0x356   : > { %2097 = vadd.xlane.f32.xlu0 %v3830_v62  ;;  %1807 = vmax.xlane.f32.xlu2 %v3827_v54 }
 0x357   : > { %2749 = vpow2.f32 %v1971_v5 }
 0x359   : > { %v2748_v45 = vpop.eup %2747 }
 0x35a   : > { %v2237_v52 = vmul.f32 %v2748_v45, %v3677_v60  ;;  %v2072_v22 = vpop.xlane.xlu2 %2071  ;;  %v1782_v17 = vpop.xlane.xlu1 %1781 }
 0x35b   : > { %2751 = vrcp.f32 %v2072_v22  ;;  %v1869_v46 = vsub.f32 %v3685_v6, %v1782_v17 }
 0x35c   : > { %2301 = vst [vmem:[%s3562_s20 + $0xc0] sm:$0xff] %v2237_v52  ;;  %v1677_v36 = vpop.f32.mrf.mxu3 }
 0x35d   : > { %v3840_v58 = vpop.eup %2749  ;;  %v1973_v41 = vmul.f32 1.442695, %v1869_v46  ;;  %v3857_v27 = vadd.f32 %v3598_v9, %v1677_v36 }
 0x35e   : > { %1809 = vmax.xlane.f32.xlu0 %v3837_v49  ;;  %2099 = vadd.xlane.f32.xlu1 %v3840_v58 }
 0x35f   : > { %2753 = vpow2.f32 %v1973_v41 }
 0x361   : > { %v2752_v60 = vpop.eup %2751 }
 0x362   : > { %v2238_v51 = vmul.f32 %v2752_v60, %v3689_v42  ;;  %v1784_v11 = vpop.xlane.xlu2 %1783  ;;  %v2074_v30 = vpop.xlane.xlu0 %2073 }
 0x363   : > { %v1870_v6 = vsub.f32 %v3697_v8, %v1784_v11  ;;  %2755 = vrcp.f32 %v2074_v30 }
 0x364   : > { %2302 = vst [vmem:[%s3562_s20 + $0xc8] sm:$0xff] %v2238_v51  ;;  %v1680_v18 = vpop.f32.mrf.mxu3 }
 0x365   : > { %v3850_v21 = vpop.eup %2753  ;;  %v1975_v61 = vmul.f32 1.442695, %v1870_v6 }
 0x366   : > { %2101 = vadd.xlane.f32.xlu2 %v3850_v21  ;;  %1811 = vmax.xlane.f32.xlu1 %v3847_v13 }
 0x367   : > { %2757 = vpow2.f32 %v1975_v61 }
 0x369   : > { %v2756_v42 = vpop.eup %2755 }
 0x36a   : > { %v2239_v34 = vmul.f32 %v2756_v42, %v3701_v3  ;;  %v2076_v7 = vpop.xlane.xlu1 %2075  ;;  %v1786_v8 = vpop.xlane.xlu0 %1785 }
 0x36b   : > { %2759 = vrcp.f32 %v2076_v7  ;;  %v1871_v28 = vsub.f32 %v3709_v25, %v1786_v8  ;;  %v3866_v25 = vadd.f32 %v3598_v9, %v1680_v18 }
 0x36c   : > { %2303 = vst [vmem:[%s3562_s20 + $0xd0] sm:$0xff] %v2239_v34  ;;  %v1683_v40 = vpop.f32.mrf.mxu3 }
 0x36d   : > { %v3860_v38 = vpop.eup %2757  ;;  %v1977_v39 = vmul.f32 1.442695, %v1871_v28  ;;  %v3879_v16 = vadd.f32 %v3598_v9, %v1683_v40 }
 0x36e   : > { %2103 = vadd.xlane.f32.xlu0 %v3860_v38  ;;  %1813 = vmax.xlane.f32.xlu2 %v3857_v27 }
 0x36f   : > { %2761 = vpow2.f32 %v1977_v39 }
 0x371   : > { %v2760_v3 = vpop.eup %2759 }
 0x372   : > { %v2240_v56 = vmul.f32 %v2760_v3, %v3713_v4  ;;  %v2078_v12 = vpop.xlane.xlu2 %2077  ;;  %v1788_v53 = vpop.xlane.xlu1 %1787 }
 0x373   : > { %2763 = vrcp.f32 %v2078_v12  ;;  %v1872_v51 = vsub.f32 %v3721_v44, %v1788_v53 }
 0x374   : > { %2304 = vst [vmem:[%s3562_s20 + $0xd8] sm:$0xff] %v2240_v56  ;;  %v1686_v37 = vpop.f32.mrf.mxu3 }
 0x375   : > { %v3869_v1 = vpop.eup %2761  ;;  %v3872_v32 = vadd.f32 %v3598_v9, %v1686_v37  ;;  %v1979_v6 = vmul.f32 1.442695, %v1872_v51 }
 0x376   : > { %1815 = vmax.xlane.f32.xlu0 %v3866_v25  ;;  %2105 = vadd.xlane.f32.xlu1 %v3869_v1 }
 0x377   : > { %1819 = vmax.xlane.f32.xlu2 %v3872_v32 }
 0x379   : > { %v2764_v4 = vpop.eup %2763 }
 0x37a   : > { %v2241_v59 = vmul.f32 %v2764_v4, %v3725_v26  ;;  %v2080_v29 = vpop.xlane.xlu0 %2079  ;;  %v1790_v52 = vpop.xlane.xlu2 %1789 }
 0x37b   : > { %2765 = vrcp.f32 %v2080_v29  ;;  %v1873_v34 = vsub.f32 %v3733_v50, %v1790_v52 }
 0x37c   : > { %2305 = vst [vmem:[%s3562_s20 + $0xe0] sm:$0xff] %v2241_v59  ;;  %v1689_v63 = vpop.f32.mrf.mxu3 }
 0x37d   : > { %v3883_v5 = vadd.f32 %v3598_v9, %v1689_v63  ;;  %v1981_v8 = vmul.f32 1.442695, %v1873_v34 }
 0x37e   : > { %1817 = vmax.xlane.f32.xlu1 %v3879_v16 }
 0x37f   : > { %1821 = vmax.xlane.f32.xlu0 %v3883_v5 }
 0x381   : > { %v2766_v45 = vpop.eup %2765 }
 0x382   : > { %v2242_v26 = vmul.f32 %v2766_v45, %v3737_v47  ;;  %v2082_v22 = vpop.xlane.xlu1 %2081  ;;  %v1792_v17 = vpop.xlane.xlu0 %1791 }
 0x383   : > { %2767 = vrcp.f32 %v2082_v22  ;;  %v1874_v46 = vsub.f32 %v3745_v57, %v1792_v17 }
 0x384   : > { %2306 = vst [vmem:[%s3562_s20 + $0xe8] sm:$0xff] %v2242_v26  ;;  %v1692_v36 = vpop.f32.mrf.mxu3 }
 0x385   : > { %v1983_v41 = vmul.f32 1.442695, %v1874_v46  ;;  %v3891_v60 = vadd.f32 %v3598_v9, %v1692_v36 }
 0x387   : > { %2769 = vpow2.f32 %v1983_v41  ;;  %1823 = vmax.xlane.f32.xlu1 %v3891_v60 }
 0x389   : > { %v2768_v11 = vpop.eup %2767 }
 0x38a   : > { %v2243_v47 = vmul.f32 %v2768_v11, %v3749_v15  ;;  %v2084_v30 = vpop.xlane.xlu2 %2083  ;;  %v1794_v61 = vpop.xlane.xlu1 %1793 }
 0x38b   : > { %2771 = vrcp.f32 %v2084_v30  ;;  %v1875_v44 = vsub.f32 %v3755_v23, %v1794_v61 }
 0x38c   : > { %2307 = vst [vmem:[%s3562_s20 + $0xf0] sm:$0xff] %v2243_v47  ;;  %v1695_v57 = vpop.f32.mrf.mxu3  ;;  %2773 = vpow2.f32 %v1979_v6 }
 0x38d   : > { %v3897_v18 = vpop.eup %2769  ;;  %v3900_v42 = vadd.f32 %v3598_v9, %v1695_v57  ;;  %v1985_v28 = vmul.f32 1.442695, %v1875_v44  ;;  %2775 = vpow2.f32 %v1981_v8 }
 0x38f   : > { %1825 = vmax.xlane.f32.xlu2 %v3900_v42  ;;  %2111 = vadd.xlane.f32.xlu1 %v3897_v18  ;;  %2777 = vpow2.f32 %v1985_v28 }
 0x391   : > { %v2772_v15 = vpop.eup %2771 }
 0x392   : > { %v2244_v7 = vmul.f32 %v2772_v15, %v3757_v33  ;;  %v1796_v39 = vpop.xlane.xlu2 %1795  ;;  %v3911_v56 = vpop.eup %2773 }
 0x393   : > { %v1876_v50 = vsub.f32 %v3765_v48, %v1796_v39  ;;  %v3916_v12 = vpop.eup %2775 }
 0x394   : > { %2308 = vst [vmem:[%s3562_s20 + $0xf8] sm:$0xff] %v2244_v7  ;;  %v1698_v40 = vpop.f32.mrf.mxu3 }
 0x395   : > { %v3909_v3 = vadd.f32 %v3598_v9, %v1698_v40  ;;  %v1987_v33 = vmul.f32 1.442695, %v1876_v50  ;;  %v3918_v37 = vpop.eup %2777 }
 0x397   : > { %1827 = vmax.xlane.f32.xlu0 %v3909_v3  ;;  %2107 = vadd.xlane.f32.xlu2 %v3911_v56 }
 0x399   : > { %v2086_v23 = vpop.xlane.xlu0 %2085 }
 0x39a   : > { %2779 = vrcp.f32 %v2086_v23 }
 0x39b   : > { %2781 = vpow2.f32 %v1987_v33 }
 0x39f   : > { %2109 = vadd.xlane.f32.xlu0 %v3916_v12  ;;  %2113 = vadd.xlane.f32.xlu2 %v3918_v37 }
 0x3a0   : > { %v2780_v9 = vpop.eup %2779 }
 0x3a1   : > { %v2245_v4 = vmul.f32 %v2780_v9, %v3771_v55  ;;  %v2088_v59 = vpop.xlane.xlu1 %2087  ;;  %v1798_v53 = vpop.xlane.xlu0 %1797 }
 0x3a2   : > { %2783 = vrcp.f32 %v2088_v59  ;;  %v1877_v48 = vsub.f32 %v3777_v14, %v1798_v53  ;;  %v3925_v63 = vpop.eup %2781 }
 0x3a3   : > { %2309 = vst [vmem:[%s3562_s20 + $0x100] sm:$0xff] %v2245_v4 }
 0x3a4   : > { %v1989_v29 = vmul.f32 1.442695, %v1877_v48 }
 0x3a6   : > { %2785 = vpow2.f32 %v1989_v29 }
 0x3a7   : > { %2115 = vadd.xlane.f32.xlu0 %v3925_v63 }
 0x3a8   : > { %v2784_v45 = vpop.eup %2783 }
 0x3a9   : > { %v2246_v52 = vmul.f32 %v2784_v45, %v3780_v24  ;;  %v2090_v26 = vpop.xlane.xlu2 %2089  ;;  %v1800_v22 = vpop.xlane.xlu1 %1799 }
 0x3aa   : > { %2787 = vrcp.f32 %v2090_v26  ;;  %v1878_v55 = vsub.f32 %v3787_v2, %v1800_v22 }
 0x3ab   : > { %2310 = vst [vmem:[%s3562_s20 + $0x108] sm:$0xff] %v2246_v52 }
 0x3ac   : > { %v3931_v17 = vpop.eup %2785  ;;  %v1991_v14 = vmul.f32 1.442695, %v1878_v55 }
 0x3ad   : > { %2117 = vadd.xlane.f32.xlu1 %v3931_v17 }
 0x3ae   : > { %2789 = vpow2.f32 %v1991_v14 }
 0x3b0   : > { %v2788_v46 = vpop.eup %2787 }
 0x3b1   : > { %v2247_v36 = vmul.f32 %v2788_v46, %v3790_v10  ;;  %v1802_v41 = vpop.xlane.xlu2 %1801  ;;  %v2092_v51 = vpop.xlane.xlu0 %2091 }
 0x3b2   : > { %v1879_v24 = vsub.f32 %v3797_v0, %v1802_v41  ;;  %2791 = vrcp.f32 %v2092_v51 }
 0x3b3   : > { %2311 = vst [vmem:[%s3562_s20 + $0x110] sm:$0xff] %v2247_v36 }
 0x3b4   : > { %v3937_v11 = vpop.eup %2789  ;;  %v1993_v2 = vmul.f32 1.442695, %v1879_v24 }
 0x3b5   : > { %2119 = vadd.xlane.f32.xlu2 %v3937_v11 }
 0x3b6   : > { %2793 = vpow2.f32 %v1993_v2 }
 0x3b8   : > { %v2792_v47 = vpop.eup %2791 }
 0x3b9   : > { %v2248_v30 = vmul.f32 %v2792_v47, %v3800_v20  ;;  %v2094_v6 = vpop.xlane.xlu1 %2093  ;;  %v1804_v57 = vpop.xlane.xlu0 %1803 }
 0x3ba   : > { %2795 = vrcp.f32 %v2094_v6  ;;  %v1880_v10 = vsub.f32 %v3807_v19, %v1804_v57 }
 0x3bb   : > { %2312 = vst [vmem:[%s3562_s20 + $0x118] sm:$0xff] %v2248_v30 }
 0x3bc   : > { %v3943_v61 = vpop.eup %2793  ;;  %v1995_v0 = vmul.f32 1.442695, %v1880_v10 }
 0x3bd   : > { %2121 = vadd.xlane.f32.xlu0 %v3943_v61 }
 0x3be   : > { %2797 = vpow2.f32 %v1995_v0 }
 0x3c0   : > { %v2796_v34 = vpop.eup %2795 }
 0x3c1   : > { %v2249_v44 = vmul.f32 %v2796_v34, %v3810_v31  ;;  %v2096_v15 = vpop.xlane.xlu2 %2095  ;;  %v1806_v7 = vpop.xlane.xlu1 %1805 }
 0x3c2   : > { %2799 = vrcp.f32 %v2096_v15  ;;  %v1881_v20 = vsub.f32 %v3817_v35, %v1806_v7 }
 0x3c3   : > { %2313 = vst [vmem:[%s3562_s20 + $0x120] sm:$0xff] %v2249_v44 }
 0x3c4   : > { %v3949_v8 = vpop.eup %2797  ;;  %v1997_v19 = vmul.f32 1.442695, %v1881_v20 }
 0x3c5   : > { %2123 = vadd.xlane.f32.xlu1 %v3949_v8 }
 0x3c6   : > { %2801 = vpow2.f32 %v1997_v19 }
 0x3c8   : > { %v2800_v28 = vpop.eup %2799 }
 0x3c9   : > { %v2250_v40 = vmul.f32 %v2800_v28, %v3820_v43  ;;  %v1808_v39 = vpop.xlane.xlu2 %1807  ;;  %v2098_v50 = vpop.xlane.xlu0 %2097 }
 0x3ca   : > { %v1882_v31 = vsub.f32 %v3827_v54, %v1808_v39  ;;  %2803 = vrcp.f32 %v2098_v50 }
 0x3cb   : > { %2314 = vst [vmem:[%s3562_s20 + $0x128] sm:$0xff] %v2250_v40 }
 0x3cc   : > { %v3955_v23 = vpop.eup %2801  ;;  %v1999_v35 = vmul.f32 1.442695, %v1882_v31 }
 0x3cd   : > { %2125 = vadd.xlane.f32.xlu2 %v3955_v23 }
 0x3ce   : > { %2805 = vpow2.f32 %v1999_v35 }
 0x3d0   : > { %v2804_v33 = vpop.eup %2803 }
 0x3d1   : > { %v2251_v9 = vmul.f32 %v2804_v33, %v3830_v62  ;;  %v2100_v4 = vpop.xlane.xlu1 %2099  ;;  %v1810_v59 = vpop.xlane.xlu0 %1809 }
 0x3d2   : > { %2807 = vrcp.f32 %v2100_v4  ;;  %v1883_v43 = vsub.f32 %v3837_v49, %v1810_v59 }
 0x3d3   : > { %2315 = vst [vmem:[%s3562_s20 + $0x130] sm:$0xff] %v2251_v9 }
 0x3d4   : > { %v3961_v53 = vpop.eup %2805  ;;  %v2001_v54 = vmul.f32 1.442695, %v1883_v43 }
 0x3d5   : > { %2127 = vadd.xlane.f32.xlu0 %v3961_v53 }
 0x3d6   : > { %2809 = vpow2.f32 %v2001_v54 }
 0x3d8   : > { %v2808_v48 = vpop.eup %2807 }
 0x3d9   : > { %v2252_v29 = vmul.f32 %v2808_v48, %v3840_v58  ;;  %v2102_v45 = vpop.xlane.xlu2 %2101  ;;  %v1812_v52 = vpop.xlane.xlu1 %1811 }
 0x3da   : > { %2811 = vrcp.f32 %v2102_v45  ;;  %v1884_v62 = vsub.f32 %v3847_v13, %v1812_v52 }
 0x3db   : > { %2316 = vst [vmem:[%s3562_s20 + $0x138] sm:$0xff] %v2252_v29 }
 0x3dc   : > { %v3967_v26 = vpop.eup %2809  ;;  %v2003_v49 = vmul.f32 1.442695, %v1884_v62 }
 0x3dd   : > { %2129 = vadd.xlane.f32.xlu1 %v3967_v26 }
 0x3de   : > { %2813 = vpow2.f32 %v2003_v49 }
 0x3e0   : > { %v2812_v22 = vpop.eup %2811 }
 0x3e1   : > { %v2253_v55 = vmul.f32 %v2812_v22, %v3850_v21  ;;  %v1814_v14 = vpop.xlane.xlu2 %1813  ;;  %v2104_v46 = vpop.xlane.xlu0 %2103 }
 0x3e2   : > { %v1885_v58 = vsub.f32 %v3857_v27, %v1814_v14  ;;  %2815 = vrcp.f32 %v2104_v46 }
 0x3e3   : > { %2317 = vst [vmem:[%s3562_s20 + $0x140] sm:$0xff] %v2253_v55 }
 0x3e4   : > { %v3973_v36 = vpop.eup %2813  ;;  %v2005_v13 = vmul.f32 1.442695, %v1885_v58 }
 0x3e5   : > { %2131 = vadd.xlane.f32.xlu2 %v3973_v36 }
 0x3e6   : > { %2817 = vpow2.f32 %v2005_v13 }
 0x3e8   : > { %v2816_v41 = vpop.eup %2815 }
 0x3e9   : > { %v2254_v51 = vmul.f32 %v2816_v41, %v3860_v38  ;;  %v2106_v24 = vpop.xlane.xlu1 %2105  ;;  %v1816_v2 = vpop.xlane.xlu0 %1815 }
 0x3ea   : > { %2819 = vrcp.f32 %v2106_v24  ;;  %v1886_v21 = vsub.f32 %v3866_v25, %v1816_v2  ;;  %v1820_v47 = vpop.xlane.xlu2 %1819 }
 0x3eb   : > { %2318 = vst [vmem:[%s3562_s20 + $0x148] sm:$0xff] %v2254_v51  ;;  %v1888_v27 = vsub.f32 %v3872_v32, %v1820_v47 }
 0x3ec   : > { %v3980_v30 = vpop.eup %2817  ;;  %v2007_v6 = vmul.f32 1.442695, %v1886_v21 }
 0x3ed   : > { %v2011_v57 = vmul.f32 1.442695, %v1888_v27  ;;  %2133 = vadd.xlane.f32.xlu0 %v3980_v30 }
 0x3ee   : > { %2821 = vpow2.f32 %v2007_v6 }
 0x3ef   : > { %2823 = vpow2.f32 %v2011_v57 }
 0x3f0   : > { %v2820_v10 = vpop.eup %2819 }
 0x3f1   : > { %v2255_v38 = vmul.f32 %v2820_v10, %v3869_v1  ;;  %v1818_v0 = vpop.xlane.xlu1 %1817 }
 0x3f2   : > { %v1887_v34 = vsub.f32 %v3879_v16, %v1818_v0  ;;  %v1822_v44 = vpop.xlane.xlu0 %1821 }
 0x3f3   : > { %2319 = vst [vmem:[%s3562_s20 + $0x150] sm:$0xff] %v2255_v38  ;;  %v1889_v25 = vsub.f32 %v3883_v5, %v1822_v44 }
 0x3f4   : > { %v3987_v15 = vpop.eup %2821  ;;  %v2009_v32 = vmul.f32 1.442695, %v1887_v34 }
 0x3f5   : > { %v3989_v7 = vpop.eup %2823  ;;  %v2013_v20 = vmul.f32 1.442695, %v1889_v25  ;;  %2135 = vadd.xlane.f32.xlu1 %v3987_v15 }
 0x3f6   : > { %2825 = vpow2.f32 %v2009_v32  ;;  %2139 = vadd.xlane.f32.xlu0 %v3989_v7 }
 0x3f7   : > { %2827 = vpow2.f32 %v2013_v20 }
 0x3fa   : > { %v1824_v1 = vpop.xlane.xlu1 %1823 }
 0x3fb   : > { %v1890_v19 = vsub.f32 %v3891_v60, %v1824_v1 }
 0x3fc   : > { %v3994_v16 = vpop.eup %2825 }
 0x3fd   : > { %v3996_v28 = vpop.eup %2827  ;;  %v2015_v5 = vmul.f32 1.442695, %v1890_v19  ;;  %2137 = vadd.xlane.f32.xlu2 %v3994_v16 }
 0x3fe   : > { %2141 = vadd.xlane.f32.xlu1 %v3996_v28 }
 0x3ff   : > { %2829 = vpow2.f32 %v2015_v5 }
 0x402   : > { %v1826_v40 = vpop.xlane.xlu2 %1825  ;;  %v2112_v39 = vpop.xlane.xlu1 %2111 }
 0x403   : > { %v1891_v50 = vsub.f32 %v3900_v42, %v1826_v40  ;;  %2831 = vrcp.f32 %v2112_v39 }
 0x405   : > { %v4001_v31 = vpop.eup %2829  ;;  %v2017_v35 = vmul.f32 1.442695, %v1891_v50 }
 0x406   : > { %2143 = vadd.xlane.f32.xlu2 %v4001_v31 }
 0x407   : > { %2833 = vpow2.f32 %v2017_v35 }
 0x409   : > { %v2832_v60 = vpop.eup %2831 }
 0x40a   : > { %v2258_v33 = vmul.f32 %v2832_v60, %v3897_v18  ;;  %v2108_v9 = vpop.xlane.xlu2 %2107  ;;  %v1828_v4 = vpop.xlane.xlu0 %1827 }
 0x40b   : > { %2835 = vrcp.f32 %v2108_v9  ;;  %v1892_v59 = vsub.f32 %v3909_v3, %v1828_v4 }
 0x40c   : > { %2322 = vst [vmem:[%s3562_s20 + $0x168] sm:$0xff] %v2258_v33 }
 0x40d   : > { %v4007_v43 = vpop.eup %2833  ;;  %v2019_v42 = vmul.f32 1.442695, %v1892_v59 }
 0x40e   : > { %2145 = vadd.xlane.f32.xlu0 %v4007_v43 }
 0x40f   : > { %2837 = vpow2.f32 %v2019_v42 }
 0x411   : > { %v2836_v54 = vpop.eup %2835 }
 0x412   : > { %v2256_v48 = vmul.f32 %v2836_v54, %v3911_v56  ;;  %v2114_v29 = vpop.xlane.xlu2 %2113  ;;  %v2110_v45 = vpop.xlane.xlu0 %2109 }
 0x413   : > { %2839 = vrcp.f32 %v2114_v29 }
 0x414   : > { %2320 = vst [vmem:[%s3562_s20 + $0x158] sm:$0xff] %v2256_v48  ;;  %2841 = vrcp.f32 %v2110_v45 }
 0x415   : > { %v4012_v18 = vpop.eup %2837 }
 0x416   : > { %2147 = vadd.xlane.f32.xlu1 %v4012_v18 }
 0x419   : > { %v2840_v3 = vpop.eup %2839 }
 0x41a   : > { %v2842_v52 = vpop.eup %2841  ;;  %v2259_v62 = vmul.f32 %v2840_v3, %v3918_v37  ;;  %v2116_v49 = vpop.xlane.xlu0 %2115 }
 0x41b   : > { %v2257_v22 = vmul.f32 %v2842_v52, %v3916_v12  ;;  %2843 = vrcp.f32 %v2116_v49 }
 0x41c   : > { %2323 = vst [vmem:[%s3562_s20 + $0x170] sm:$0xff] %v2259_v62 }
 0x41d   : > { %2321 = vst [vmem:[%s3562_s20 + $0x160] sm:$0xff] %v2257_v22 }
 0x420   : > { %v2118_v56 = vpop.xlane.xlu1 %2117 }
 0x421   : > { %v2844_v55 = vpop.eup %2843  ;;  %2845 = vrcp.f32 %v2118_v56 }
 0x422   : > { %v2260_v14 = vmul.f32 %v2844_v55, %v3925_v63 }
 0x424   : > { %2324 = vst [vmem:[%s3562_s20 + $0x178] sm:$0xff] %v2260_v14 }
 0x427   : > { %v2846_v46 = vpop.eup %2845 }
 0x428   : > { %v2261_v58 = vmul.f32 %v2846_v46, %v3931_v17  ;;  %v2120_v13 = vpop.xlane.xlu2 %2119 }
 0x429   : > { %2847 = vrcp.f32 %v2120_v13 }
 0x42a   : > { %2325 = vst [vmem:[%s3562_s20 + $0x180] sm:$0xff] %v2261_v58 }
 0x42f   : > { %v2848_v37 = vpop.eup %2847 }
 0x430   : > { %v2262_v12 = vmul.f32 %v2848_v37, %v3937_v11  ;;  %v2122_v41 = vpop.xlane.xlu0 %2121 }
 0x431   : > { %2849 = vrcp.f32 %v2122_v41 }
 0x432   : > { %2326 = vst [vmem:[%s3562_s20 + $0x188] sm:$0xff] %v2262_v12 }
 0x437   : > { %v2850_v51 = vpop.eup %2849 }
 0x438   : > { %v2263_v24 = vmul.f32 %v2850_v51, %v3943_v61  ;;  %v2124_v63 = vpop.xlane.xlu1 %2123 }
 0x439   : > { %2851 = vrcp.f32 %v2124_v63 }
 0x43a   : > { %2327 = vst [vmem:[%s3562_s20 + $0x190] sm:$0xff] %v2263_v24 }
 0x43f   : > { %v2852_v2 = vpop.eup %2851 }
 0x440   : > { %v2264_v17 = vmul.f32 %v2852_v2, %v3949_v8  ;;  %v2126_v21 = vpop.xlane.xlu2 %2125 }
 0x441   : > { %2853 = vrcp.f32 %v2126_v21 }
 0x442   : > { %2328 = vst [vmem:[%s3562_s20 + $0x198] sm:$0xff] %v2264_v17 }
 0x447   : > { %v2854_v47 = vpop.eup %2853 }
 0x448   : > { %v2265_v11 = vmul.f32 %v2854_v47, %v3955_v23  ;;  %v2128_v27 = vpop.xlane.xlu0 %2127 }
 0x449   : > { %2855 = vrcp.f32 %v2128_v27 }
 0x44a   : > { %2329 = vst [vmem:[%s3562_s20 + $0x1a0] sm:$0xff] %v2265_v11 }
 0x44f   : > { %v2856_v6 = vpop.eup %2855 }
 0x450   : > { %v2266_v61 = vmul.f32 %v2856_v6, %v3961_v53  ;;  %v2130_v57 = vpop.xlane.xlu1 %2129 }
 0x451   : > { %2857 = vrcp.f32 %v2130_v57 }
 0x452   : > { %2330 = vst [vmem:[%s3562_s20 + $0x1a8] sm:$0xff] %v2266_v61 }
 0x457   : > { %v2858_v10 = vpop.eup %2857 }
 0x458   : > { %v2267_v8 = vmul.f32 %v2858_v10, %v3967_v26  ;;  %v2132_v38 = vpop.xlane.xlu2 %2131 }
 0x459   : > { %2859 = vrcp.f32 %v2132_v38 }
 0x45a   : > { %2331 = vst [vmem:[%s3562_s20 + $0x1b0] sm:$0xff] %v2267_v8 }
 0x45f   : > { %v2860_v0 = vpop.eup %2859 }
 0x460   : > { %v2268_v23 = vmul.f32 %v2860_v0, %v3973_v36  ;;  %v2134_v34 = vpop.xlane.xlu0 %2133 }
 0x461   : > { %2861 = vrcp.f32 %v2134_v34 }
 0x462   : > { %2332 = vst [vmem:[%s3562_s20 + $0x1b8] sm:$0xff] %v2268_v23 }
 0x467   : > { %v2862_v44 = vpop.eup %2861 }
 0x468   : > { %v2269_v53 = vmul.f32 %v2862_v44, %v3980_v30  ;;  %v2136_v25 = vpop.xlane.xlu1 %2135 }
 0x469   : > { %2863 = vrcp.f32 %v2136_v25  ;;  %v2140_v32 = vpop.xlane.xlu0 %2139 }
 0x46a   : > { %2333 = vst [vmem:[%s3562_s20 + $0x1c0] sm:$0xff] %v2269_v53  ;;  %2865 = vrcp.f32 %v2140_v32 }
 0x46f   : > { %v2864_v26 = vpop.eup %2863 }
 0x470   : > { %v2866_v20 = vpop.eup %2865  ;;  %v2270_v1 = vmul.f32 %v2864_v26, %v3987_v15  ;;  %v2138_v36 = vpop.xlane.xlu2 %2137 }
 0x471   : > { %v2272_v19 = vmul.f32 %v2866_v20, %v3989_v7  ;;  %2867 = vrcp.f32 %v2138_v36  ;;  %v2142_v5 = vpop.xlane.xlu1 %2141 }
 0x472   : > { %2334 = vst [vmem:[%s3562_s20 + $0x1c8] sm:$0xff] %v2270_v1  ;;  %2869 = vrcp.f32 %v2142_v5 }
 0x473   : > { %2336 = vst [vmem:[%s3562_s20 + $0x1d8] sm:$0xff] %v2272_v19 }
 0x477   : > { %v2868_v30 = vpop.eup %2867 }
 0x478   : > { %v2870_v40 = vpop.eup %2869  ;;  %v2271_v39 = vmul.f32 %v2868_v30, %v3994_v16 }
 0x479   : > { %v2273_v50 = vmul.f32 %v2870_v40, %v3996_v28  ;;  %v2144_v35 = vpop.xlane.xlu2 %2143 }
 0x47a   : > { %2335 = vst [vmem:[%s3562_s20 + $0x1d0] sm:$0xff] %v2271_v39  ;;  %2871 = vrcp.f32 %v2144_v35 }
 0x47b   : > { %2337 = vst [vmem:[%s3562_s20 + $0x1e0] sm:$0xff] %v2273_v50 }
 0x480   : > { %v2872_v15 = vpop.eup %2871 }
 0x481   : > { %v2274_v7 = vmul.f32 %v2872_v15, %v4001_v31  ;;  %v2146_v60 = vpop.xlane.xlu0 %2145 }
 0x482   : > { %2873 = vrcp.f32 %v2146_v60 }
 0x483   : > { %2338 = vst [vmem:[%s3562_s20 + $0x1e8] sm:$0xff] %v2274_v7 }
 0x488   : > { %v2874_v33 = vpop.eup %2873 }
 0x489   : > { %v2275_v9 = vmul.f32 %v2874_v33, %v4007_v43  ;;  %v2148_v4 = vpop.xlane.xlu1 %2147 }
 0x48a   : > { %2875 = vrcp.f32 %v2148_v4 }
 0x48b   : > { %2339 = vst [vmem:[%s3562_s20 + $0x1f0] sm:$0xff] %v2275_v9 }
 0x490   : > { %v2876_v16 = vpop.eup %2875 }
 0x491   : > { %v2276_v28 = vmul.f32 %v2876_v16, %v4012_v18 }
 0x493   : > { %2340 = vst [vmem:[%s3562_s20 + $0x1f8] sm:$0xff] %v2276_v28 }
 0x494 PF: > { %s17_s24 = sadd.s32 1, %s2886_s24  }
 0x495   : > { %p14_p4 = scmp.ge.s32.totalorder %s17_s24, 4  }
 0x497   :  { %16 = sbr.rel (!%p14_p4) target bundleno = 1 (0x1), region = 78 }

</bundles_post_ra>
